<compile_context>
chip_gen: v5e
topology: v5e:2x2
jax: 0.10.0
libtpu: 0.0.40
codegen_flags: <defaults>
</compile_context>

<pallas_src>
import functools

import jax
import jax.numpy as jnp
from jax import lax
from jax.experimental import pallas as pl
from jax.experimental.pallas import tpu as pltpu


def _round_up(x, m):
    return ((x + m - 1) // m) * m


# ----------------------------- Pallas kernel --------------------------------

def wide_deep_kernel(idx_ref, num_ref, w1e_ref, w1n_ref, b1_ref, w2_ref, b2_ref,
                     w3_ref, b3_ref, o_ref):
    """Fused embedding-gather + wide + deep forward on one batch tile.

    idx_ref: (n_cat, TB) int32  global (offset) category ids, batch on lanes
    num_ref: (n_num, TB) f32    numeric features, batch on lanes
    w1e_ref: (M1, C_pad) bf16   rows [0:H1) = Linear-1 weight folded with the deep
                                embedding tables; row H1 = wide embedding values;
                                rows (H1:M1) = zero padding
    w1n_ref: (M1, n_num) f32    Linear-1 weight for the numeric features
    b1_ref : (H1, 1)     f32
    w2_ref : (H2, H1)    bf16
    b2_ref : (H2, 1)     f32
    w3_ref : (8, H2)     bf16   row 0 = Linear-3 weight, rows 1..7 = 0
    b3_ref : (1, 1)      f32
    o_ref  : (1, TB)     f32    sigmoid(wide + deep), lane-dense
    """
    n_cat, tb = idx_ref.shape
    c_pad = w1e_ref.shape[1]
    h1 = b1_ref.shape[0]

    # Combined one-hot over all categorical features (each column has n_cat ones).
    row_ids = lax.broadcasted_iota(jnp.int32, (c_pad, tb), 0)
    onehot = jnp.zeros((c_pad, tb), jnp.float32)
    for i in range(n_cat):
        onehot = jnp.where(row_ids == idx_ref[i:i + 1, :], 1.0, onehot)
    onehot = onehot.astype(jnp.bfloat16)

    # Embedding lookup + Linear-1 + wide sum, all as one MXU matmul over the
    # one-hot, plus a small f32 matmul for the numeric features.
    pre = jnp.dot(w1e_ref[...], onehot, preferred_element_type=jnp.float32)
    pre = pre + jnp.dot(w1n_ref[...], num_ref[...],
                        preferred_element_type=jnp.float32)          # (M1, TB)

    h1a = jnp.maximum(pre[:h1, :] + b1_ref[...], 0.0).astype(jnp.bfloat16)
    wide = pre[h1:h1 + 1, :]                                          # (1, TB) f32

    # Deep MLP tail: (Dropout = identity) -> Linear -> ReLU -> Linear
    h2 = jnp.dot(w2_ref[...], h1a, preferred_element_type=jnp.float32) + b2_ref[...]
    h2 = jnp.maximum(h2, 0.0).astype(jnp.bfloat16)                    # (H2, TB)
    deep = jnp.dot(w3_ref[...], h2, preferred_element_type=jnp.float32)  # (8, TB)

    logits = wide + deep[0:1, :] + b3_ref[...]                        # (1, TB)
    o_ref[...] = jax.nn.sigmoid(logits)


def wide_deep_pallas(gidx, num_t, kernel_params, tb):
    """gidx: (n_cat, B_pad) int32; num_t: (n_num, B_pad) f32 -> (1, B_pad) f32."""
    n_cat, b_pad = gidx.shape
    n_num = num_t.shape[0]
    w1e, w1n, b1, w2, b2, w3, b3 = kernel_params

    def resident(arr):
        # Weight/bias blocks: same block index every step -> stays VMEM resident.
        return pl.BlockSpec(arr.shape, lambda i: (0, 0))

    return pl.pallas_call(
        wide_deep_kernel,
        out_shape=jax.ShapeDtypeStruct((1, b_pad), jnp.float32),
        grid=(b_pad // tb,),
        in_specs=[
            pl.BlockSpec((n_cat, tb), lambda i: (0, i)),   # streamed indices
            pl.BlockSpec((n_num, tb), lambda i: (0, i)),   # streamed numerics
            resident(w1e), resident(w1n), resident(b1),
            resident(w2), resident(b2), resident(w3), resident(b3),
        ],
        out_specs=pl.BlockSpec((1, tb), lambda i: (0, i)),
        compiler_params=pltpu.CompilerParams(
            dimension_semantics=("parallel",),
            vmem_limit_bytes=48 * 1024 * 1024,
        ),
    )(gidx, num_t, w1e, w1n, b1, w2, b2, w3, b3)


# ------------------------- Parameter construction ---------------------------

def init_params(key, cardinalities, numeric_dim=8, emb_dim=16, mlp_hidden=(128, 64)):
    n_cat = len(cardinalities)
    keys = jax.random.split(key, 2 * n_cat + 2 * (len(mlp_hidden) + 1))
    ki = iter(range(len(keys)))

    # nn.init.normal_(std=0.01) for every embedding table.
    wide_tables = [0.01 * jax.random.normal(keys[next(ki)], (c, 1), jnp.float32)
                   for c in cardinalities]
    deep_tables = [0.01 * jax.random.normal(keys[next(ki)], (c, emb_dim), jnp.float32)
                   for c in cardinalities]

    deep_input_dim = n_cat * emb_dim + numeric_dim
    dims = [deep_input_dim, *mlp_hidden, 1]
    mlp = []
    for d_in, d_out in zip(dims[:-1], dims[1:]):
        # Linear-like init; stored as (in, out) so x @ W + b == PyTorch x @ W.T + b.
        bound = 1.0 / jnp.sqrt(d_in)
        W = jax.random.uniform(keys[next(ki)], (d_in, d_out), jnp.float32, -bound, bound)
        b = jax.random.uniform(keys[next(ki)], (1, d_out), jnp.float32, -bound, bound)
        mlp += [W, b]
    return wide_tables, deep_tables, tuple(mlp)


def prepare_kernel_params(mlp_params, wide_tables, deep_tables, emb_dim):
    """Fold the embedding tables into Linear-1 and lay weights out for the kernel."""
    w1, b1, w2, b2, w3, b3 = mlp_params
    d_in, h1 = w1.shape
    h2 = w2.shape[1]
    n_cat = len(deep_tables)
    n_num = d_in - n_cat * emb_dim
    cards = [int(t.shape[0]) for t in deep_tables]
    c_total = sum(cards)
    c_pad = _round_up(c_total, 16)            # bf16 sublane pack; K-pass friendly
    m1 = _round_up(h1 + 1, 16)                # H1 deep rows + 1 wide row (+ pad)

    w1e = jnp.zeros((m1, c_pad), jnp.float32)
    off = 0
    offsets = []
    for i, c in enumerate(cards):
        offsets.append(off)
        # (C_i, emb) @ (emb, H1) -> per-category folded first-layer contribution.
        fold = deep_tables[i] @ w1[i * emb_dim:(i + 1) * emb_dim, :]   # (C_i, H1)
        w1e = w1e.at[:h1, off:off + c].set(fold.T)
        w1e = w1e.at[h1, off:off + c].set(wide_tables[i][:, 0])        # wide row
        off += c
    w1n = jnp.zeros((m1, n_num), jnp.float32).at[:h1, :].set(w1[n_cat * emb_dim:, :].T)
    w3r = jnp.zeros((8, h2), jnp.float32).at[0, :].set(w3[:, 0])

    params = (w1e.astype(jnp.bfloat16),       # (M1, C_pad)
              w1n,                            # (M1, n_num) f32
              b1.T.astype(jnp.float32),       # (H1, 1)
              w2.T.astype(jnp.bfloat16),      # (H2, H1)
              b2.T.astype(jnp.float32),       # (H2, 1)
              w3r.astype(jnp.bfloat16),       # (8, H2)
              b3.astype(jnp.float32))         # (1, 1)
    return params, tuple(offsets)


# ------------------------------ Forward glue ---------------------------------

def _choose_tile(b, tb_max):
    """Pick a lane-multiple batch tile that bounds padding waste to <128 cols/tile."""
    n_tiles = -(-b // tb_max)
    tb = _round_up(-(-b // n_tiles), 128)
    return tb, n_tiles * tb


def forward(categorical, numerical, kernel_params, offsets, tb_max=4096):
    """categorical: int32 (B, N_cat); numerical: float32 (B, N_num) -> (B,) probs."""
    B, n_cat = categorical.shape
    tb, b_pad = _choose_tile(B, tb_max)

    off = jnp.asarray(offsets, jnp.int32)
    gidx = (categorical.astype(jnp.int32) + off[None, :]).T            # (n_cat, B)
    gidx = jnp.pad(gidx, ((0, 0), (0, b_pad - B)))                     # pad cols -> id 0
    num_t = jnp.pad(numerical.astype(jnp.float32).T, ((0, 0), (0, b_pad - B)))

    out = wide_deep_pallas(gidx, num_t, kernel_params, tb)             # (1, b_pad)
    return out[0, :B]


# Pure-JAX f32 reference (matches the PyTorch module).
def forward_ref(categorical, numerical, wide_tables, deep_tables, mlp_params):
    n_cat = categorical.shape[1]
    wide = sum(wide_tables[i][categorical[:, i]] for i in range(n_cat))    # (B, 1)
    deep_embs = [deep_tables[i][categorical[:, i]] for i in range(n_cat)]
    x = jnp.concatenate(deep_embs + [numerical.astype(jnp.float32)], axis=1)
    w1, b1, w2, b2, w3, b3 = mlp_params
    h1 = jnp.maximum(x @ w1 + b1, 0.0)
    h2 = jnp.maximum(h1 @ w2 + b2, 0.0)
    logits = wide + (h2 @ w3 + b3)
    return jax.nn.sigmoid(logits)[:, 0]


# ---------------------------------- Main -------------------------------------

if __name__ == "__main__":
    B = 8
    cardinalities = [50, 20, 10, 30, 15, 25, 40, 12, 8]    # cat_0 ... cat_8
    numeric_dim = 8
    emb_dim = 16
    mlp_hidden = (128, 64)
    n_cat = len(cardinalities)

    key = jax.random.PRNGKey(0)
    k_param, k_cat, k_num = jax.random.split(key, 3)

    wide_tables, deep_tables, mlp_params = init_params(
        k_param, cardinalities, numeric_dim, emb_dim, mlp_hidden)
    kernel_params, offsets = prepare_kernel_params(
        mlp_params, wide_tables, deep_tables, emb_dim)

    cat_keys = jax.random.split(k_cat, n_cat)
    categorical = jnp.stack(
        [jax.random.randint(cat_keys[i], (B,), 0, c, dtype=jnp.int32)
         for i, c in enumerate(cardinalities)], axis=1)                 # (B, 9)
    numerical = jax.random.normal(k_num, (B, numeric_dim), jnp.float32)  # (B, 8)

    fwd = jax.jit(functools.partial(forward, offsets=offsets))
    probs = jax.block_until_ready(fwd(categorical, numerical, kernel_params))

    ref = forward_ref(categorical, numerical, wide_tables, deep_tables, mlp_params)
    assert probs.shape == (B,)
    # bf16 MXU inputs with f32 accumulation -> relaxed tolerance vs f32 reference.
    assert jnp.allclose(probs, ref, atol=2e-2, rtol=2e-2), (probs, ref)

    print("KERNEL_OK")
</pallas_src>

<mosaic_0001>
module attributes {stable_mosaic.version = 11 : i64} {
  func.func @wide_deep_kernel(%arg0: i32, %arg1: memref<9x128xi32, #tpu.memory_space<vmem>>, %arg2: memref<8x128xf32, #tpu.memory_space<vmem>>, %arg3: memref<144x224xbf16, #tpu.memory_space<vmem>>, %arg4: memref<144x8xf32, #tpu.memory_space<vmem>>, %arg5: memref<128x1xf32, #tpu.memory_space<vmem>>, %arg6: memref<64x128xbf16, #tpu.memory_space<vmem>>, %arg7: memref<64x1xf32, #tpu.memory_space<vmem>>, %arg8: memref<8x64xbf16, #tpu.memory_space<vmem>>, %arg9: memref<1x1xf32, #tpu.memory_space<vmem>>, %arg10: memref<1x128xf32, #tpu.memory_space<vmem>>) attributes {dimension_semantics = [#tpu.dimension_semantics<parallel>], iteration_bounds = array<i64: 1>, scalar_prefetch = 0 : i64, scratch_operands = 0 : i64, tpu.core_type = #tpu.core_type<tc>, window_params = [{transform_indices = @transform_0, window_bounds = array<i64: 9, 128>}, {transform_indices = @transform_1, window_bounds = array<i64: 8, 128>}, {pipeline_mode = #tpu.pipeline_mode<synchronous>, transform_indices = @transform_2, window_bounds = array<i64: 144, 224>}, {pipeline_mode = #tpu.pipeline_mode<synchronous>, transform_indices = @transform_3, window_bounds = array<i64: 144, 8>}, {pipeline_mode = #tpu.pipeline_mode<synchronous>, transform_indices = @transform_4, window_bounds = array<i64: 128, 1>}, {pipeline_mode = #tpu.pipeline_mode<synchronous>, transform_indices = @transform_5, window_bounds = array<i64: 64, 128>}, {pipeline_mode = #tpu.pipeline_mode<synchronous>, transform_indices = @transform_6, window_bounds = array<i64: 64, 1>}, {pipeline_mode = #tpu.pipeline_mode<synchronous>, transform_indices = @transform_7, window_bounds = array<i64: 8, 64>}, {pipeline_mode = #tpu.pipeline_mode<synchronous>, transform_indices = @transform_8, window_bounds = array<i64: 1, 1>}, {transform_indices = @transform_9, window_bounds = array<i64: 1, 128>}]} {
    %0 = tpu.iota {dimensions = array<i32: 0>} : vector<224x128xi32>
    %cst = arith.constant 0.000000e+00 : f32
    %1 = vector.broadcast %cst : f32 to vector<224x128xf32>
    %c0 = arith.constant 0 : index
    %c0_0 = arith.constant 0 : index
    %2 = vector.load %arg1[%c0, %c0_0] : memref<9x128xi32, #tpu.memory_space<vmem>>, vector<1x128xi32>
    %3 = vector.broadcast %2 : vector<1x128xi32> to vector<224x128xi32>
    %4 = arith.cmpi eq, %0, %3 : vector<224x128xi32>
    %cst_1 = arith.constant 1.000000e+00 : f32
    %5 = vector.broadcast %cst_1 : f32 to vector<224x128xf32>
    %6 = arith.select %4, %5, %1 : vector<224x128xi1>, vector<224x128xf32>
    %c1 = arith.constant 1 : index
    %c0_2 = arith.constant 0 : index
    %7 = vector.load %arg1[%c1, %c0_2] : memref<9x128xi32, #tpu.memory_space<vmem>>, vector<1x128xi32>
    %8 = vector.broadcast %7 : vector<1x128xi32> to vector<224x128xi32>
    %9 = arith.cmpi eq, %0, %8 : vector<224x128xi32>
    %cst_3 = arith.constant 1.000000e+00 : f32
    %10 = vector.broadcast %cst_3 : f32 to vector<224x128xf32>
    %11 = arith.select %9, %10, %6 : vector<224x128xi1>, vector<224x128xf32>
    %c2 = arith.constant 2 : index
    %c0_4 = arith.constant 0 : index
    %12 = vector.load %arg1[%c2, %c0_4] : memref<9x128xi32, #tpu.memory_space<vmem>>, vector<1x128xi32>
    %13 = vector.broadcast %12 : vector<1x128xi32> to vector<224x128xi32>
    %14 = arith.cmpi eq, %0, %13 : vector<224x128xi32>
    %cst_5 = arith.constant 1.000000e+00 : f32
    %15 = vector.broadcast %cst_5 : f32 to vector<224x128xf32>
    %16 = arith.select %14, %15, %11 : vector<224x128xi1>, vector<224x128xf32>
    %c3 = arith.constant 3 : index
    %c0_6 = arith.constant 0 : index
    %17 = vector.load %arg1[%c3, %c0_6] : memref<9x128xi32, #tpu.memory_space<vmem>>, vector<1x128xi32>
    %18 = vector.broadcast %17 : vector<1x128xi32> to vector<224x128xi32>
    %19 = arith.cmpi eq, %0, %18 : vector<224x128xi32>
    %cst_7 = arith.constant 1.000000e+00 : f32
    %20 = vector.broadcast %cst_7 : f32 to vector<224x128xf32>
    %21 = arith.select %19, %20, %16 : vector<224x128xi1>, vector<224x128xf32>
    %c4 = arith.constant 4 : index
    %c0_8 = arith.constant 0 : index
    %22 = vector.load %arg1[%c4, %c0_8] : memref<9x128xi32, #tpu.memory_space<vmem>>, vector<1x128xi32>
    %23 = vector.broadcast %22 : vector<1x128xi32> to vector<224x128xi32>
    %24 = arith.cmpi eq, %0, %23 : vector<224x128xi32>
    %cst_9 = arith.constant 1.000000e+00 : f32
    %25 = vector.broadcast %cst_9 : f32 to vector<224x128xf32>
    %26 = arith.select %24, %25, %21 : vector<224x128xi1>, vector<224x128xf32>
    %c5 = arith.constant 5 : index
    %c0_10 = arith.constant 0 : index
    %27 = vector.load %arg1[%c5, %c0_10] : memref<9x128xi32, #tpu.memory_space<vmem>>, vector<1x128xi32>
    %28 = vector.broadcast %27 : vector<1x128xi32> to vector<224x128xi32>
    %29 = arith.cmpi eq, %0, %28 : vector<224x128xi32>
    %cst_11 = arith.constant 1.000000e+00 : f32
    %30 = vector.broadcast %cst_11 : f32 to vector<224x128xf32>
    %31 = arith.select %29, %30, %26 : vector<224x128xi1>, vector<224x128xf32>
    %c6 = arith.constant 6 : index
    %c0_12 = arith.constant 0 : index
    %32 = vector.load %arg1[%c6, %c0_12] : memref<9x128xi32, #tpu.memory_space<vmem>>, vector<1x128xi32>
    %33 = vector.broadcast %32 : vector<1x128xi32> to vector<224x128xi32>
    %34 = arith.cmpi eq, %0, %33 : vector<224x128xi32>
    %cst_13 = arith.constant 1.000000e+00 : f32
    %35 = vector.broadcast %cst_13 : f32 to vector<224x128xf32>
    %36 = arith.select %34, %35, %31 : vector<224x128xi1>, vector<224x128xf32>
    %c7 = arith.constant 7 : index
    %c0_14 = arith.constant 0 : index
    %37 = vector.load %arg1[%c7, %c0_14] : memref<9x128xi32, #tpu.memory_space<vmem>>, vector<1x128xi32>
    %38 = vector.broadcast %37 : vector<1x128xi32> to vector<224x128xi32>
    %39 = arith.cmpi eq, %0, %38 : vector<224x128xi32>
    %cst_15 = arith.constant 1.000000e+00 : f32
    %40 = vector.broadcast %cst_15 : f32 to vector<224x128xf32>
    %41 = arith.select %39, %40, %36 : vector<224x128xi1>, vector<224x128xf32>
    %c8 = arith.constant 8 : index
    %c0_16 = arith.constant 0 : index
    %42 = vector.load %arg1[%c8, %c0_16] : memref<9x128xi32, #tpu.memory_space<vmem>>, vector<1x128xi32>
    %43 = vector.broadcast %42 : vector<1x128xi32> to vector<224x128xi32>
    %44 = arith.cmpi eq, %0, %43 : vector<224x128xi32>
    %cst_17 = arith.constant 1.000000e+00 : f32
    %45 = vector.broadcast %cst_17 : f32 to vector<224x128xf32>
    %46 = arith.select %44, %45, %41 : vector<224x128xi1>, vector<224x128xf32>
    %47 = arith.truncf %46 : vector<224x128xf32> to vector<224x128xbf16>
    %c0_18 = arith.constant 0 : index
    %c0_19 = arith.constant 0 : index
    %48 = vector.load %arg3[%c0_18, %c0_19] : memref<144x224xbf16, #tpu.memory_space<vmem>>, vector<144x224xbf16>
    %cst_20 = arith.constant dense<0.000000e+00> : vector<144x128xf32>
    %49 = tpu.matmul %48, %47, %cst_20 {dimension_numbers = #tpu.dot_dimension_numbers<[1], [0], [0], [1], [0, 0, 1, 1], [], []>} : vector<144x224xbf16>, vector<224x128xbf16>, vector<144x128xf32> -> vector<144x128xf32>
    %c0_21 = arith.constant 0 : index
    %c0_22 = arith.constant 0 : index
    %50 = vector.load %arg4[%c0_21, %c0_22] : memref<144x8xf32, #tpu.memory_space<vmem>>, vector<144x8xf32>
    %c0_23 = arith.constant 0 : index
    %c0_24 = arith.constant 0 : index
    %51 = vector.load %arg2[%c0_23, %c0_24] : memref<8x128xf32, #tpu.memory_space<vmem>>, vector<8x128xf32>
    %cst_25 = arith.constant dense<0.000000e+00> : vector<144x128xf32>
    %52 = tpu.matmul %50, %51, %cst_25 {dimension_numbers = #tpu.dot_dimension_numbers<[1], [0], [0], [1], [0, 0, 1, 1], [], []>} : vector<144x8xf32>, vector<8x128xf32>, vector<144x128xf32> -> vector<144x128xf32>
    %53 = arith.addf %49, %52 : vector<144x128xf32>
    %54 = vector.extract_strided_slice %53 {offsets = [0, 0], sizes = [128, 128], strides = [1, 1]} : vector<144x128xf32> to vector<128x128xf32>
    %c0_26 = arith.constant 0 : index
    %c0_27 = arith.constant 0 : index
    %55 = vector.load %arg5[%c0_26, %c0_27] : memref<128x1xf32, #tpu.memory_space<vmem>>, vector<128x1xf32>
    %56 = vector.broadcast %55 : vector<128x1xf32> to vector<128x128xf32>
    %57 = arith.addf %54, %56 : vector<128x128xf32>
    %cst_28 = arith.constant 0.000000e+00 : f32
    %58 = vector.broadcast %cst_28 : f32 to vector<128x128xf32>
    %59 = arith.maximumf %57, %58 : vector<128x128xf32>
    %60 = arith.truncf %59 : vector<128x128xf32> to vector<128x128xbf16>
    %61 = vector.extract_strided_slice %53 {offsets = [128, 0], sizes = [1, 128], strides = [1, 1]} : vector<144x128xf32> to vector<1x128xf32>
    %c0_29 = arith.constant 0 : index
    %c0_30 = arith.constant 0 : index
    %62 = vector.load %arg6[%c0_29, %c0_30] : memref<64x128xbf16, #tpu.memory_space<vmem>>, vector<64x128xbf16>
    %cst_31 = arith.constant dense<0.000000e+00> : vector<64x128xf32>
    %63 = tpu.matmul %62, %60, %cst_31 {dimension_numbers = #tpu.dot_dimension_numbers<[1], [0], [0], [1], [0, 0, 1, 1], [], []>} : vector<64x128xbf16>, vector<128x128xbf16>, vector<64x128xf32> -> vector<64x128xf32>
    %c0_32 = arith.constant 0 : index
    %c0_33 = arith.constant 0 : index
    %64 = vector.load %arg7[%c0_32, %c0_33] : memref<64x1xf32, #tpu.memory_space<vmem>>, vector<64x1xf32>
    %65 = vector.broadcast %64 : vector<64x1xf32> to vector<64x128xf32>
    %66 = arith.addf %63, %65 : vector<64x128xf32>
    %cst_34 = arith.constant 0.000000e+00 : f32
    %67 = vector.broadcast %cst_34 : f32 to vector<64x128xf32>
    %68 = arith.maximumf %66, %67 : vector<64x128xf32>
    %69 = arith.truncf %68 : vector<64x128xf32> to vector<64x128xbf16>
    %c0_35 = arith.constant 0 : index
    %c0_36 = arith.constant 0 : index
    %70 = vector.load %arg8[%c0_35, %c0_36] : memref<8x64xbf16, #tpu.memory_space<vmem>>, vector<8x64xbf16>
    %cst_37 = arith.constant dense<0.000000e+00> : vector<8x128xf32>
    %71 = tpu.matmul %70, %69, %cst_37 {dimension_numbers = #tpu.dot_dimension_numbers<[1], [0], [0], [1], [0, 0, 1, 1], [], []>} : vector<8x64xbf16>, vector<64x128xbf16>, vector<8x128xf32> -> vector<8x128xf32>
    %72 = vector.extract_strided_slice %71 {offsets = [0, 0], sizes = [1, 128], strides = [1, 1]} : vector<8x128xf32> to vector<1x128xf32>
    %73 = arith.addf %61, %72 : vector<1x128xf32>
    %c0_38 = arith.constant 0 : index
    %c0_39 = arith.constant 0 : index
    %74 = vector.load %arg9[%c0_38, %c0_39] : memref<1x1xf32, #tpu.memory_space<vmem>>, vector<1x1xf32>
    %75 = vector.broadcast %74 : vector<1x1xf32> to vector<1x128xf32>
    %76 = arith.addf %73, %75 : vector<1x128xf32>
    %77 = arith.negf %76 : vector<1x128xf32>
    %78 = math.exp %77 : vector<1x128xf32>
    %cst_40 = arith.constant 1.000000e+00 : f32
    %79 = vector.broadcast %cst_40 : f32 to vector<1x128xf32>
    %80 = arith.addf %79, %78 : vector<1x128xf32>
    %81 = arith.divf %79, %80 : vector<1x128xf32>
    %c0_41 = arith.constant 0 : index
    %c0_42 = arith.constant 0 : index
    %82 = vector.load %arg10[%c0_41, %c0_42] : memref<1x128xf32, #tpu.memory_space<vmem>>, vector<1x128xf32>
    tpu.vector_store %arg10[%c0_41, %c0_42], %81 {strides = array<i32>} : memref<1x128xf32, #tpu.memory_space<vmem>>, vector<1x128xf32>,
    return
  }
  func.func @transform_0(%arg0: i32) -> (i32, i32) {
    %c0_i32 = arith.constant 0 : i32
    %c0_i32_0 = arith.constant 0 : i32
    return %c0_i32, %arg0 : i32, i32
  }
  func.func @transform_1(%arg0: i32) -> (i32, i32) {
    %c0_i32 = arith.constant 0 : i32
    %c0_i32_0 = arith.constant 0 : i32
    return %c0_i32, %arg0 : i32, i32
  }
  func.func @transform_2(%arg0: i32) -> (i32, i32) {
    %c0_i32 = arith.constant 0 : i32
    %c0_i32_0 = arith.constant 0 : i32
    %c0_i32_1 = arith.constant 0 : i32
    return %c0_i32, %c0_i32_0 : i32, i32
  }
  func.func @transform_3(%arg0: i32) -> (i32, i32) {
    %c0_i32 = arith.constant 0 : i32
    %c0_i32_0 = arith.constant 0 : i32
    %c0_i32_1 = arith.constant 0 : i32
    return %c0_i32, %c0_i32_0 : i32, i32
  }
  func.func @transform_4(%arg0: i32) -> (i32, i32) {
    %c0_i32 = arith.constant 0 : i32
    %c0_i32_0 = arith.constant 0 : i32
    %c0_i32_1 = arith.constant 0 : i32
    return %c0_i32, %c0_i32_0 : i32, i32
  }
  func.func @transform_5(%arg0: i32) -> (i32, i32) {
    %c0_i32 = arith.constant 0 : i32
    %c0_i32_0 = arith.constant 0 : i32
    %c0_i32_1 = arith.constant 0 : i32
    return %c0_i32, %c0_i32_0 : i32, i32
  }
  func.func @transform_6(%arg0: i32) -> (i32, i32) {
    %c0_i32 = arith.constant 0 : i32
    %c0_i32_0 = arith.constant 0 : i32
    %c0_i32_1 = arith.constant 0 : i32
    return %c0_i32, %c0_i32_0 : i32, i32
  }
  func.func @transform_7(%arg0: i32) -> (i32, i32) {
    %c0_i32 = arith.constant 0 : i32
    %c0_i32_0 = arith.constant 0 : i32
    %c0_i32_1 = arith.constant 0 : i32
    return %c0_i32, %c0_i32_0 : i32, i32
  }
  func.func @transform_8(%arg0: i32) -> (i32, i32) {
    %c0_i32 = arith.constant 0 : i32
    %c0_i32_0 = arith.constant 0 : i32
    %c0_i32_1 = arith.constant 0 : i32
    return %c0_i32, %c0_i32_0 : i32, i32
  }
  func.func @transform_9(%arg0: i32) -> (i32, i32) {
    %c0_i32 = arith.constant 0 : i32
    %c0_i32_0 = arith.constant 0 : i32
    return %c0_i32, %arg0 : i32, i32
  }
}

</mosaic_0001>

<bundles_post_ra>
// kernel: forward.1
= control target key start
LH: loop header
LB: loop body
LE: loop exit
PB: predicated region body
PF: predicated region fallthrough
CT: control target
= control target key end

     0   :  { %v35_v0 = vlaneseq  ;;  %v1451_v10 = vmov 0.0   ;;  %s2365_s0 = inlined_call_operand.vmem [shape: s32[9,128], index: 0, kind: input, shape index: {}]   ;;  %s2366_s4 = inlined_call_operand.vmem [shape: f32[128,1], index: 4, kind: input, shape index: {}]   ;;  %s2367_s2 = inlined_call_operand.vmem [shape: bf16[144,224], index: 2, kind: input, shape index: {}]   ;;  %s2368_s1 = inlined_call_operand.vmem [shape: f32[8,128], index: 1, kind: input, shape index: {}]   ;;  %s2369_s3 = inlined_call_operand.vmem [shape: f32[144,8], index: 3, kind: input, shape index: {}]   ;;  %s2370_s6 = inlined_call_operand.vmem [shape: f32[64,1], index: 6, kind: input, shape index: {}]   ;;  %s2371_s8 = inlined_call_operand.<no memory space> [shape: f32[1,1], index: 8, kind: input, shape index: {}]   ;;  %s2372_s5 = inlined_call_operand.vmem [shape: bf16[64,128], index: 5, kind: input, shape index: {}]   ;;  %s2373_s7 = inlined_call_operand.vmem [shape: bf16[8,64], index: 7, kind: input, shape index: {}]   ;;  %s2374_s9 = inlined_call_operand.vmem [shape: f32[1,128], index: 9, kind: output, shape index: {}]  }
   0x1   :  { %v1506_v1 = vld [vmem:[%s2365_s0] ss:$0 sm:$0xff]  ;;  %v1513_v3 = vld [vmem:[%s2365_s0 + $0x1] ss:$0 sm:$0xff]  ;;  %v1518_v4 = vld [vmem:[%s2365_s0 + $0x2] ss:$0 sm:$0xff] }
   0x2   :  { %v1508_v2 = vshrl.u32 %v35_v0, 7  ;;  %v1525_v7 = vld [vmem:[%s2365_s0 + $0x3] ss:$0 sm:$0xff]  ;;  %v1530_v8 = vld [vmem:[%s2365_s0 + $0x4] ss:$0 sm:$0xff] }
   0x3   :  { %v1539_v9 = vld [vmem:[%s2365_s0 + $0x5] ss:$0 sm:$0xff]  ;;  %v1548_v13 = vld [vmem:[%s2365_s0 + $0x6] ss:$0 sm:$0xff]  ;;  %v1555_v16 = vld [vmem:[%s2365_s0 + $0x7] ss:$0 sm:$0xff] }
   0x4   :  { %v50_v5 = vadd.s32 112, %v1508_v2  ;;  %v51_v6 = vadd.s32 120, %v1508_v2  ;;  %v1562_v19 = vld [vmem:[%s2365_s0 + $0x8] ss:$0 sm:$0xff]  ;;  %v62_v30 = vadd.s32 208, %v1508_v2  ;;  %v63_v31 = vadd.s32 216, %v1508_v2 }
   0x5   :  { %v1575_v34 = vadd.s32 96, %v1508_v2  ;;  %v1578_v35 = vadd.s32 104, %v1508_v2 }
   0x6   :  { %vm80_vm0 = vcmp.eq.s32.totalorder %v50_v5, %v1506_v1  ;;  %vm81_vm1 = vcmp.eq.s32.totalorder %v51_v6, %v1506_v1  ;;  %vm138_vm2 = vcmp.eq.s32.totalorder %v50_v5, %v1513_v3  ;;  %vm139_vm3 = vcmp.eq.s32.totalorder %v51_v6, %v1513_v3 }
   0x7   :  { %v108_v11 = vsel %vm80_vm0, 1.0, %v1451_v10  ;;  %v109_v12 = vsel %vm81_vm1, 1.0, %v1451_v10  ;;  %vm196_vm4 = vcmp.eq.s32.totalorder %v50_v5, %v1518_v4  ;;  %vm197_vm5 = vcmp.eq.s32.totalorder %v51_v6, %v1518_v4 }
   0x8   :  { %v166_v14 = vsel %vm138_vm2, 1.0, %v108_v11  ;;  %v167_v15 = vsel %vm139_vm3, 1.0, %v109_v12  ;;  %vm254_vm6 = vcmp.eq.s32.totalorder %v50_v5, %v1525_v7  ;;  %vm255_vm7 = vcmp.eq.s32.totalorder %v51_v6, %v1525_v7 }
   0x9   :  { %v224_v17 = vsel %vm196_vm4, 1.0, %v166_v14  ;;  %v225_v18 = vsel %vm197_vm5, 1.0, %v167_v15  ;;  %vm312_vm8 = vcmp.eq.s32.totalorder %v50_v5, %v1530_v8  ;;  %vm313_vm9 = vcmp.eq.s32.totalorder %v51_v6, %v1530_v8 }
   0xa   :  { %v282_v20 = vsel %vm254_vm6, 1.0, %v224_v17  ;;  %v283_v21 = vsel %vm255_vm7, 1.0, %v225_v18  ;;  %vm370_vm10 = vcmp.eq.s32.totalorder %v50_v5, %v1539_v9  ;;  %vm371_vm11 = vcmp.eq.s32.totalorder %v51_v6, %v1539_v9 }
   0xb   :  { %v340_v22 = vsel %vm312_vm8, 1.0, %v282_v20  ;;  %v341_v23 = vsel %vm313_vm9, 1.0, %v283_v21  ;;  %vm428_vm12 = vcmp.eq.s32.totalorder %v50_v5, %v1548_v13  ;;  %vm429_vm13 = vcmp.eq.s32.totalorder %v51_v6, %v1548_v13 }
   0xc   :  { %v398_v24 = vsel %vm370_vm10, 1.0, %v340_v22  ;;  %v399_v25 = vsel %vm371_vm11, 1.0, %v341_v23  ;;  %vm486_vm14 = vcmp.eq.s32.totalorder %v50_v5, %v1555_v16  ;;  %vm487_vm15 = vcmp.eq.s32.totalorder %v51_v6, %v1555_v16 }
   0xd   :  { %v456_v26 = vsel %vm428_vm12, 1.0, %v398_v24  ;;  %v457_v27 = vsel %vm429_vm13, 1.0, %v399_v25  ;;  %vm544_vm0 = vcmp.eq.s32.totalorder %v50_v5, %v1562_v19  ;;  %vm545_vm1 = vcmp.eq.s32.totalorder %v51_v6, %v1562_v19 }
   0xe   :  { %v514_v28 = vsel %vm486_vm14, 1.0, %v456_v26  ;;  %v515_v29 = vsel %vm487_vm15, 1.0, %v457_v27  ;;  %vm92_vm2 = vcmp.eq.s32.totalorder %v62_v30, %v1506_v1  ;;  %vm93_vm3 = vcmp.eq.s32.totalorder %v63_v31, %v1506_v1 }
   0xf   :  { %v572_v32 = vsel %vm544_vm0, 1.0, %v514_v28  ;;  %v573_v33 = vsel %vm545_vm1, 1.0, %v515_v29  ;;  %vm150_vm4 = vcmp.eq.s32.totalorder %v62_v30, %v1513_v3  ;;  %v120_v37 = vsel %vm92_vm2, 1.0, %v1451_v10 }
  0x10   :  { %v593_v36 = vpack.c.bf16 %v573_v33, %v572_v32  ;;  %v121_v38 = vsel %vm93_vm3, 1.0, %v1451_v10  ;;  %vm151_vm5 = vcmp.eq.s32.totalorder %v63_v31, %v1513_v3  ;;  %vm208_vm6 = vcmp.eq.s32.totalorder %v62_v30, %v1518_v4 }
  0x11   :  { %v178_v39 = vsel %vm150_vm4, 1.0, %v120_v37  ;;  %v179_v40 = vsel %vm151_vm5, 1.0, %v121_v38  ;;  %vm209_vm7 = vcmp.eq.s32.totalorder %v63_v31, %v1518_v4  ;;  %vm266_vm8 = vcmp.eq.s32.totalorder %v62_v30, %v1525_v7 }
  0x12   :  { %871 = vmatpush.bf16.msra.mxu1 %v593_v36  ;;  %v236_v41 = vsel %vm208_vm6, 1.0, %v178_v39  ;;  %v237_v42 = vsel %vm209_vm7, 1.0, %v179_v40  ;;  %vm267_vm9 = vcmp.eq.s32.totalorder %v63_v31, %v1525_v7  ;;  %vm324_vm10 = vcmp.eq.s32.totalorder %v62_v30, %v1530_v8 }
  0x13   :  { %v294_v43 = vsel %vm266_vm8, 1.0, %v236_v41  ;;  %v295_v44 = vsel %vm267_vm9, 1.0, %v237_v42  ;;  %vm325_vm11 = vcmp.eq.s32.totalorder %v63_v31, %v1530_v8  ;;  %vm382_vm12 = vcmp.eq.s32.totalorder %v62_v30, %v1539_v9 }
  0x14   :  { %v352_v45 = vsel %vm324_vm10, 1.0, %v294_v43  ;;  %v353_v46 = vsel %vm325_vm11, 1.0, %v295_v44  ;;  %vm383_vm13 = vcmp.eq.s32.totalorder %v63_v31, %v1539_v9  ;;  %vm440_vm14 = vcmp.eq.s32.totalorder %v62_v30, %v1548_v13 }
  0x15   :  { %v410_v47 = vsel %vm382_vm12, 1.0, %v352_v45  ;;  %v411_v48 = vsel %vm383_vm13, 1.0, %v353_v46  ;;  %vm441_vm15 = vcmp.eq.s32.totalorder %v63_v31, %v1548_v13  ;;  %vm498_vm0 = vcmp.eq.s32.totalorder %v62_v30, %v1555_v16 }
  0x16   :  { %v468_v49 = vsel %vm440_vm14, 1.0, %v410_v47  ;;  %v469_v50 = vsel %vm441_vm15, 1.0, %v411_v48  ;;  %vm499_vm1 = vcmp.eq.s32.totalorder %v63_v31, %v1555_v16  ;;  %vm556_vm2 = vcmp.eq.s32.totalorder %v62_v30, %v1562_v19 }
  0x17   :  { %v526_v51 = vsel %vm498_vm0, 1.0, %v468_v49  ;;  %v527_v52 = vsel %vm499_vm1, 1.0, %v469_v50  ;;  %vm557_vm3 = vcmp.eq.s32.totalorder %v63_v31, %v1562_v19  ;;  %vm78_vm4 = vcmp.eq.s32.totalorder %v1575_v34, %v1506_v1 }
  0x18   :  { %v584_v53 = vsel %vm556_vm2, 1.0, %v526_v51  ;;  %v585_v54 = vsel %vm557_vm3, 1.0, %v527_v52  ;;  %vm79_vm5 = vcmp.eq.s32.totalorder %v1578_v35, %v1506_v1  ;;  %v106_v55 = vsel %vm78_vm4, 1.0, %v1451_v10 }
  0x19   :  { %v599_v56 = vpack.c.bf16 %v585_v54, %v584_v53  ;;  %v107_v57 = vsel %vm79_vm5, 1.0, %v1451_v10  ;;  %vm136_vm6 = vcmp.eq.s32.totalorder %v1575_v34, %v1513_v3  ;;  %vm137_vm7 = vcmp.eq.s32.totalorder %v1578_v35, %v1513_v3 }
  0x1a   :  { %v164_v58 = vsel %vm136_vm6, 1.0, %v106_v55  ;;  %v165_v59 = vsel %vm137_vm7, 1.0, %v107_v57  ;;  %vm194_vm8 = vcmp.eq.s32.totalorder %v1575_v34, %v1518_v4  ;;  %vm195_vm9 = vcmp.eq.s32.totalorder %v1578_v35, %v1518_v4 }
  0x1b   :  { %926 = vmatpush.bf16.msra.mxu2 %v599_v56  ;;  %v222_v60 = vsel %vm194_vm8, 1.0, %v164_v58  ;;  %v223_v61 = vsel %vm195_vm9, 1.0, %v165_v59  ;;  %vm252_vm10 = vcmp.eq.s32.totalorder %v1575_v34, %v1525_v7  ;;  %vm253_vm11 = vcmp.eq.s32.totalorder %v1578_v35, %v1525_v7 }
  0x1c   :  { %v280_v62 = vsel %vm252_vm10, 1.0, %v222_v60  ;;  %v281_v63 = vsel %vm253_vm11, 1.0, %v223_v61  ;;  %vm310_vm12 = vcmp.eq.s32.totalorder %v1575_v34, %v1530_v8  ;;  %vm311_vm13 = vcmp.eq.s32.totalorder %v1578_v35, %v1530_v8 }
  0x1d   :  { %v338_v0 = vsel %vm310_vm12, 1.0, %v280_v62  ;;  %v339_v5 = vsel %vm311_vm13, 1.0, %v281_v63  ;;  %vm368_vm14 = vcmp.eq.s32.totalorder %v1575_v34, %v1539_v9  ;;  %vm369_vm15 = vcmp.eq.s32.totalorder %v1578_v35, %v1539_v9 }
  0x1e   :  { %v396_v6 = vsel %vm368_vm14, 1.0, %v338_v0  ;;  %v397_v11 = vsel %vm369_vm15, 1.0, %v339_v5  ;;  %vm426_vm0 = vcmp.eq.s32.totalorder %v1575_v34, %v1548_v13  ;;  %vm427_vm1 = vcmp.eq.s32.totalorder %v1578_v35, %v1548_v13 }
  0x1f   :  { %v454_v12 = vsel %vm426_vm0, 1.0, %v396_v6  ;;  %v455_v14 = vsel %vm427_vm1, 1.0, %v397_v11  ;;  %vm484_vm2 = vcmp.eq.s32.totalorder %v1575_v34, %v1555_v16  ;;  %vm485_vm3 = vcmp.eq.s32.totalorder %v1578_v35, %v1555_v16 }
  0x20   :  { %v512_v15 = vsel %vm484_vm2, 1.0, %v454_v12  ;;  %v513_v17 = vsel %vm485_vm3, 1.0, %v455_v14  ;;  %vm542_vm4 = vcmp.eq.s32.totalorder %v1575_v34, %v1562_v19  ;;  %vm543_vm5 = vcmp.eq.s32.totalorder %v1578_v35, %v1562_v19 }
  0x21   :  { %v570_v18 = vsel %vm542_vm4, 1.0, %v512_v15  ;;  %v571_v20 = vsel %vm543_vm5, 1.0, %v513_v17  ;;  %v60_v21 = vadd.s32 192, %v1508_v2  ;;  %v61_v22 = vadd.s32 200, %v1508_v2 }
  0x22   :  { %v592_v23 = vpack.c.bf16 %v571_v20, %v570_v18  ;;  %v1641_v24 = vadd.s32 80, %v1508_v2  ;;  %v1644_v25 = vadd.s32 88, %v1508_v2  ;;  %v1647_v26 = vadd.s32 176, %v1508_v2 }
  0x23   :  { %vm90_vm6 = vcmp.eq.s32.totalorder %v60_v21, %v1506_v1  ;;  %vm91_vm7 = vcmp.eq.s32.totalorder %v61_v22, %v1506_v1  ;;  %vm148_vm8 = vcmp.eq.s32.totalorder %v60_v21, %v1513_v3  ;;  %vm149_vm9 = vcmp.eq.s32.totalorder %v61_v22, %v1513_v3 }
  0x24   :  { %872 = vmatpush.bf16.msra.mxu1 %v592_v23  ;;  %v118_v27 = vsel %vm90_vm6, 1.0, %v1451_v10  ;;  %v119_v28 = vsel %vm91_vm7, 1.0, %v1451_v10  ;;  %vm206_vm10 = vcmp.eq.s32.totalorder %v60_v21, %v1518_v4  ;;  %vm207_vm11 = vcmp.eq.s32.totalorder %v61_v22, %v1518_v4 }
  0x25   :  { %v176_v29 = vsel %vm148_vm8, 1.0, %v118_v27  ;;  %v177_v30 = vsel %vm149_vm9, 1.0, %v119_v28  ;;  %vm264_vm12 = vcmp.eq.s32.totalorder %v60_v21, %v1525_v7  ;;  %vm265_vm13 = vcmp.eq.s32.totalorder %v61_v22, %v1525_v7 }
  0x26   :  { %v234_v31 = vsel %vm206_vm10, 1.0, %v176_v29  ;;  %v235_v32 = vsel %vm207_vm11, 1.0, %v177_v30  ;;  %vm322_vm14 = vcmp.eq.s32.totalorder %v60_v21, %v1530_v8  ;;  %vm323_vm15 = vcmp.eq.s32.totalorder %v61_v22, %v1530_v8 }
  0x27   :  { %v292_v33 = vsel %vm264_vm12, 1.0, %v234_v31  ;;  %v293_v34 = vsel %vm265_vm13, 1.0, %v235_v32  ;;  %vm380_vm0 = vcmp.eq.s32.totalorder %v60_v21, %v1539_v9  ;;  %vm381_vm1 = vcmp.eq.s32.totalorder %v61_v22, %v1539_v9 }
  0x28   :  { %v350_v35 = vsel %vm322_vm14, 1.0, %v292_v33  ;;  %v351_v36 = vsel %vm323_vm15, 1.0, %v293_v34  ;;  %vm438_vm2 = vcmp.eq.s32.totalorder %v60_v21, %v1548_v13  ;;  %vm439_vm3 = vcmp.eq.s32.totalorder %v61_v22, %v1548_v13  ;;  %v991_v33 = vld [vmem:[%s2366_s4 + $0x70] sm:$0xff] }
  0x29   :  { %v408_v37 = vsel %vm380_vm0, 1.0, %v350_v35  ;;  %v409_v38 = vsel %vm381_vm1, 1.0, %v351_v36  ;;  %vm496_vm4 = vcmp.eq.s32.totalorder %v60_v21, %v1555_v16  ;;  %vm497_vm5 = vcmp.eq.s32.totalorder %v61_v22, %v1555_v16 }
  0x2a   :  { %v466_v39 = vsel %vm438_vm2, 1.0, %v408_v37  ;;  %v467_v40 = vsel %vm439_vm3, 1.0, %v409_v38  ;;  %vm554_vm6 = vcmp.eq.s32.totalorder %v60_v21, %v1562_v19  ;;  %vm555_vm7 = vcmp.eq.s32.totalorder %v61_v22, %v1562_v19 }
  0x2b   :  { %v524_v41 = vsel %vm496_vm4, 1.0, %v466_v39  ;;  %v525_v42 = vsel %vm497_vm5, 1.0, %v467_v40  ;;  %vm76_vm8 = vcmp.eq.s32.totalorder %v1641_v24, %v1506_v1  ;;  %vm77_vm9 = vcmp.eq.s32.totalorder %v1644_v25, %v1506_v1 }
  0x2c   :  { %v582_v43 = vsel %vm554_vm6, 1.0, %v524_v41  ;;  %v583_v44 = vsel %vm555_vm7, 1.0, %v525_v42  ;;  %v104_v45 = vsel %vm76_vm8, 1.0, %v1451_v10  ;;  %v105_v46 = vsel %vm77_vm9, 1.0, %v1451_v10 }
  0x2d   :  { %v598_v47 = vpack.c.bf16 %v583_v44, %v582_v43  ;;  %vm134_vm10 = vcmp.eq.s32.totalorder %v1641_v24, %v1513_v3  ;;  %vm135_vm11 = vcmp.eq.s32.totalorder %v1644_v25, %v1513_v3  ;;  %vm192_vm12 = vcmp.eq.s32.totalorder %v1641_v24, %v1518_v4 }
  0x2e   :  { %v162_v48 = vsel %vm134_vm10, 1.0, %v104_v45  ;;  %v163_v49 = vsel %vm135_vm11, 1.0, %v105_v46  ;;  %vm193_vm13 = vcmp.eq.s32.totalorder %v1644_v25, %v1518_v4  ;;  %vm250_vm14 = vcmp.eq.s32.totalorder %v1641_v24, %v1525_v7 }
  0x2f   :  { %927 = vmatpush.bf16.msra.mxu2 %v598_v47  ;;  %v220_v50 = vsel %vm192_vm12, 1.0, %v162_v48  ;;  %v221_v51 = vsel %vm193_vm13, 1.0, %v163_v49  ;;  %vm251_vm15 = vcmp.eq.s32.totalorder %v1644_v25, %v1525_v7  ;;  %vm308_vm0 = vcmp.eq.s32.totalorder %v1641_v24, %v1530_v8 }
  0x30   :  { %v278_v52 = vsel %vm250_vm14, 1.0, %v220_v50  ;;  %v279_v53 = vsel %vm251_vm15, 1.0, %v221_v51  ;;  %vm309_vm1 = vcmp.eq.s32.totalorder %v1644_v25, %v1530_v8  ;;  %vm366_vm2 = vcmp.eq.s32.totalorder %v1641_v24, %v1539_v9 }
  0x31   :  { %v336_v54 = vsel %vm308_vm0, 1.0, %v278_v52  ;;  %v337_v55 = vsel %vm309_vm1, 1.0, %v279_v53  ;;  %vm367_vm3 = vcmp.eq.s32.totalorder %v1644_v25, %v1539_v9  ;;  %vm424_vm4 = vcmp.eq.s32.totalorder %v1641_v24, %v1548_v13 }
  0x32   :  { %v394_v56 = vsel %vm366_vm2, 1.0, %v336_v54  ;;  %v395_v57 = vsel %vm367_vm3, 1.0, %v337_v55  ;;  %vm425_vm5 = vcmp.eq.s32.totalorder %v1644_v25, %v1548_v13  ;;  %vm482_vm6 = vcmp.eq.s32.totalorder %v1641_v24, %v1555_v16 }
  0x33   :  { %v452_v58 = vsel %vm424_vm4, 1.0, %v394_v56  ;;  %v453_v59 = vsel %vm425_vm5, 1.0, %v395_v57  ;;  %vm483_vm7 = vcmp.eq.s32.totalorder %v1644_v25, %v1555_v16  ;;  %vm540_vm8 = vcmp.eq.s32.totalorder %v1641_v24, %v1562_v19 }
  0x34   :  { %v510_v60 = vsel %vm482_vm6, 1.0, %v452_v58  ;;  %v511_v61 = vsel %vm483_vm7, 1.0, %v453_v59  ;;  %vm541_vm9 = vcmp.eq.s32.totalorder %v1644_v25, %v1562_v19  ;;  %v59_v62 = vadd.s32 184, %v1508_v2 }
  0x35   :  { %v568_v63 = vsel %vm540_vm8, 1.0, %v510_v60  ;;  %v569_v0 = vsel %vm541_vm9, 1.0, %v511_v61  ;;  %vm88_vm10 = vcmp.eq.s32.totalorder %v1647_v26, %v1506_v1  ;;  %vm146_vm11 = vcmp.eq.s32.totalorder %v1647_v26, %v1513_v3 }
  0x36   :  { %v591_v5 = vpack.c.bf16 %v569_v0, %v568_v63  ;;  %vm89_vm12 = vcmp.eq.s32.totalorder %v59_v62, %v1506_v1  ;;  %v116_v6 = vsel %vm88_vm10, 1.0, %v1451_v10  ;;  %vm147_vm13 = vcmp.eq.s32.totalorder %v59_v62, %v1513_v3 }
  0x37   :  { %v117_v11 = vsel %vm89_vm12, 1.0, %v1451_v10  ;;  %v174_v12 = vsel %vm146_vm11, 1.0, %v116_v6  ;;  %vm204_vm14 = vcmp.eq.s32.totalorder %v1647_v26, %v1518_v4  ;;  %vm205_vm15 = vcmp.eq.s32.totalorder %v59_v62, %v1518_v4 }
  0x38   :  { %873 = vmatpush.bf16.msra.mxu1 %v591_v5  ;;  %v175_v14 = vsel %vm147_vm13, 1.0, %v117_v11  ;;  %v232_v15 = vsel %vm204_vm14, 1.0, %v174_v12  ;;  %vm262_vm0 = vcmp.eq.s32.totalorder %v1647_v26, %v1525_v7  ;;  %vm263_vm1 = vcmp.eq.s32.totalorder %v59_v62, %v1525_v7 }
  0x39   :  { %v233_v17 = vsel %vm205_vm15, 1.0, %v175_v14  ;;  %v290_v18 = vsel %vm262_vm0, 1.0, %v232_v15  ;;  %vm320_vm2 = vcmp.eq.s32.totalorder %v1647_v26, %v1530_v8  ;;  %vm321_vm3 = vcmp.eq.s32.totalorder %v59_v62, %v1530_v8 }
  0x3a   :  { %v291_v20 = vsel %vm263_vm1, 1.0, %v233_v17  ;;  %v348_v21 = vsel %vm320_vm2, 1.0, %v290_v18  ;;  %vm378_vm4 = vcmp.eq.s32.totalorder %v1647_v26, %v1539_v9  ;;  %vm379_vm5 = vcmp.eq.s32.totalorder %v59_v62, %v1539_v9 }
  0x3b   :  { %v349_v22 = vsel %vm321_vm3, 1.0, %v291_v20  ;;  %v406_v23 = vsel %vm378_vm4, 1.0, %v348_v21  ;;  %vm436_vm6 = vcmp.eq.s32.totalorder %v1647_v26, %v1548_v13  ;;  %vm437_vm7 = vcmp.eq.s32.totalorder %v59_v62, %v1548_v13 }
  0x3c   :  { %v407_v24 = vsel %vm379_vm5, 1.0, %v349_v22  ;;  %v464_v25 = vsel %vm436_vm6, 1.0, %v406_v23  ;;  %vm494_vm8 = vcmp.eq.s32.totalorder %v1647_v26, %v1555_v16  ;;  %vm495_vm9 = vcmp.eq.s32.totalorder %v59_v62, %v1555_v16 }
  0x3d   :  { %v465_v27 = vsel %vm437_vm7, 1.0, %v407_v24  ;;  %v522_v28 = vsel %vm494_vm8, 1.0, %v464_v25  ;;  %vm552_vm10 = vcmp.eq.s32.totalorder %v1647_v26, %v1562_v19  ;;  %vm553_vm11 = vcmp.eq.s32.totalorder %v59_v62, %v1562_v19 }
  0x3e   :  { %v523_v29 = vsel %vm495_vm9, 1.0, %v465_v27  ;;  %v580_v30 = vsel %vm552_vm10, 1.0, %v522_v28  ;;  %v44_v31 = vadd.s32 64, %v1508_v2  ;;  %v45_v32 = vadd.s32 72, %v1508_v2 }
  0x3f   :  { %v581_v34 = vsel %vm553_vm11, 1.0, %v523_v29  ;;  %v1743_v35 = vadd.s32 160, %v1508_v2  ;;  %v1746_v36 = vadd.s32 168, %v1508_v2  ;;  %v1452_v37 = vmov 0  }
  0x40   :  { %v597_v26 = vpack.c.bf16 %v581_v34, %v580_v30  ;;  %vm74_vm12 = vcmp.eq.s32.totalorder %v44_v31, %v1506_v1  ;;  %vm75_vm13 = vcmp.eq.s32.totalorder %v45_v32, %v1506_v1  ;;  %vm132_vm14 = vcmp.eq.s32.totalorder %v44_v31, %v1513_v3  ;;  %1426 = vset.pattern.permute.xlu0 %v1452_v37 }
  0x41   :  { %v102_v38 = vsel %vm74_vm12, 1.0, %v1451_v10  ;;  %v103_v39 = vsel %vm75_vm13, 1.0, %v1451_v10  ;;  %vm133_vm15 = vcmp.eq.s32.totalorder %v45_v32, %v1513_v3  ;;  %vm190_vm0 = vcmp.eq.s32.totalorder %v44_v31, %v1518_v4  ;;  %1065 = vperm.xlu0 %1426, %v991_v33   ;;  %1428 = vset.pattern.permute.xlu2 %v1452_v37 }
  0x42   :  { %928 = vmatpush.bf16.msra.mxu2 %v597_v26  ;;  %v160_v40 = vsel %vm132_vm14, 1.0, %v102_v38  ;;  %v161_v41 = vsel %vm133_vm15, 1.0, %v103_v39  ;;  %vm191_vm1 = vcmp.eq.s32.totalorder %v45_v32, %v1518_v4  ;;  %vm248_vm2 = vcmp.eq.s32.totalorder %v44_v31, %v1525_v7  ;;  %1427 = vset.pattern.permute.xlu1 %v1452_v37 }
  0x43   :  { %v218_v42 = vsel %vm190_vm0, 1.0, %v160_v40  ;;  %v219_v43 = vsel %vm191_vm1, 1.0, %v161_v41  ;;  %vm249_vm3 = vcmp.eq.s32.totalorder %v45_v32, %v1525_v7  ;;  %vm306_vm4 = vcmp.eq.s32.totalorder %v44_v31, %v1530_v8 }
  0x44   :  { %v276_v44 = vsel %vm248_vm2, 1.0, %v218_v42  ;;  %v277_v45 = vsel %vm249_vm3, 1.0, %v219_v43  ;;  %vm307_vm5 = vcmp.eq.s32.totalorder %v45_v32, %v1530_v8  ;;  %vm364_vm6 = vcmp.eq.s32.totalorder %v44_v31, %v1539_v9 }
  0x45   :  { %v334_v46 = vsel %vm306_vm4, 1.0, %v276_v44  ;;  %v335_v47 = vsel %vm307_vm5, 1.0, %v277_v45  ;;  %vm365_vm7 = vcmp.eq.s32.totalorder %v45_v32, %v1539_v9  ;;  %vm422_vm8 = vcmp.eq.s32.totalorder %v44_v31, %v1548_v13 }
  0x46   :  { %v392_v48 = vsel %vm364_vm6, 1.0, %v334_v46  ;;  %v393_v49 = vsel %vm365_vm7, 1.0, %v335_v47  ;;  %vm423_vm9 = vcmp.eq.s32.totalorder %v45_v32, %v1548_v13  ;;  %vm480_vm10 = vcmp.eq.s32.totalorder %v44_v31, %v1555_v16 }
  0x47   :  { %v450_v50 = vsel %vm422_vm8, 1.0, %v392_v48  ;;  %v451_v51 = vsel %vm423_vm9, 1.0, %v393_v49  ;;  %vm481_vm11 = vcmp.eq.s32.totalorder %v45_v32, %v1555_v16  ;;  %vm538_vm12 = vcmp.eq.s32.totalorder %v44_v31, %v1562_v19  ;;  %v992_v48 = vld [vmem:[%s2366_s4 + $0x78] sm:$0xff] }
  0x48   :  { %v508_v52 = vsel %vm480_vm10, 1.0, %v450_v50  ;;  %v509_v53 = vsel %vm481_vm11, 1.0, %v451_v51  ;;  %vm539_vm13 = vcmp.eq.s32.totalorder %v45_v32, %v1562_v19  ;;  %vm86_vm14 = vcmp.eq.s32.totalorder %v1743_v35, %v1506_v1 }
  0x49   :  { %v566_v54 = vsel %vm538_vm12, 1.0, %v508_v52  ;;  %v567_v55 = vsel %vm539_vm13, 1.0, %v509_v53  ;;  %vm87_vm15 = vcmp.eq.s32.totalorder %v1746_v36, %v1506_v1  ;;  %v114_v56 = vsel %vm86_vm14, 1.0, %v1451_v10  ;;  %1070 = vperm.xlu0 %1426, %v992_v48  }
  0x4a   :  { %v590_v57 = vpack.c.bf16 %v567_v55, %v566_v54  ;;  %v115_v58 = vsel %vm87_vm15, 1.0, %v1451_v10  ;;  %vm144_vm0 = vcmp.eq.s32.totalorder %v1743_v35, %v1513_v3  ;;  %vm145_vm1 = vcmp.eq.s32.totalorder %v1746_v36, %v1513_v3 }
  0x4b   :  { %v172_v59 = vsel %vm144_vm0, 1.0, %v114_v56  ;;  %v173_v60 = vsel %vm145_vm1, 1.0, %v115_v58  ;;  %vm202_vm2 = vcmp.eq.s32.totalorder %v1743_v35, %v1518_v4  ;;  %vm203_vm3 = vcmp.eq.s32.totalorder %v1746_v36, %v1518_v4 }
  0x4c   :  { %874 = vmatpush.bf16.msra.mxu1 %v590_v57  ;;  %v230_v61 = vsel %vm202_vm2, 1.0, %v172_v59  ;;  %v231_v62 = vsel %vm203_vm3, 1.0, %v173_v60  ;;  %vm260_vm4 = vcmp.eq.s32.totalorder %v1743_v35, %v1525_v7  ;;  %vm261_vm5 = vcmp.eq.s32.totalorder %v1746_v36, %v1525_v7 }
  0x4d   :  { %v288_v63 = vsel %vm260_vm4, 1.0, %v230_v61  ;;  %v289_v0 = vsel %vm261_vm5, 1.0, %v231_v62  ;;  %vm318_vm6 = vcmp.eq.s32.totalorder %v1743_v35, %v1530_v8  ;;  %vm319_vm7 = vcmp.eq.s32.totalorder %v1746_v36, %v1530_v8 }
  0x4e   :  { %v346_v5 = vsel %vm318_vm6, 1.0, %v288_v63  ;;  %v347_v6 = vsel %vm319_vm7, 1.0, %v289_v0  ;;  %vm376_vm8 = vcmp.eq.s32.totalorder %v1743_v35, %v1539_v9  ;;  %vm377_vm9 = vcmp.eq.s32.totalorder %v1746_v36, %v1539_v9 }
  0x4f   :  { %v404_v11 = vsel %vm376_vm8, 1.0, %v346_v5  ;;  %v405_v12 = vsel %vm377_vm9, 1.0, %v347_v6  ;;  %vm434_vm10 = vcmp.eq.s32.totalorder %v1743_v35, %v1548_v13  ;;  %vm435_vm11 = vcmp.eq.s32.totalorder %v1746_v36, %v1548_v13 }
  0x50   :  { %v462_v14 = vsel %vm434_vm10, 1.0, %v404_v11  ;;  %v463_v15 = vsel %vm435_vm11, 1.0, %v405_v12  ;;  %vm492_vm12 = vcmp.eq.s32.totalorder %v1743_v35, %v1555_v16  ;;  %vm493_vm13 = vcmp.eq.s32.totalorder %v1746_v36, %v1555_v16 }
  0x51   :  { %v520_v17 = vsel %vm492_vm12, 1.0, %v462_v14  ;;  %v521_v18 = vsel %vm493_vm13, 1.0, %v463_v15  ;;  %vm550_vm14 = vcmp.eq.s32.totalorder %v1743_v35, %v1562_v19  ;;  %vm551_vm15 = vcmp.eq.s32.totalorder %v1746_v36, %v1562_v19 }
  0x52   :  { %v578_v20 = vsel %vm550_vm14, 1.0, %v520_v17  ;;  %v579_v21 = vsel %vm551_vm15, 1.0, %v521_v18  ;;  %v42_v22 = vadd.s32 48, %v1508_v2  ;;  %v43_v23 = vadd.s32 56, %v1508_v2 }
  0x53   :  { %v596_v24 = vpack.c.bf16 %v579_v21, %v578_v20  ;;  %v1809_v25 = vadd.s32 144, %v1508_v2  ;;  %v1812_v27 = vadd.s32 152, %v1508_v2  ;;  %v1815_v28 = vadd.s32 32, %v1508_v2 }
  0x54   :  { %vm72_vm0 = vcmp.eq.s32.totalorder %v42_v22, %v1506_v1  ;;  %vm73_vm1 = vcmp.eq.s32.totalorder %v43_v23, %v1506_v1  ;;  %vm130_vm2 = vcmp.eq.s32.totalorder %v42_v22, %v1513_v3  ;;  %vm131_vm3 = vcmp.eq.s32.totalorder %v43_v23, %v1513_v3 }
  0x55   :  { %929 = vmatpush.bf16.msra.mxu2 %v596_v24  ;;  %v100_v29 = vsel %vm72_vm0, 1.0, %v1451_v10  ;;  %v101_v30 = vsel %vm73_vm1, 1.0, %v1451_v10  ;;  %vm188_vm4 = vcmp.eq.s32.totalorder %v42_v22, %v1518_v4  ;;  %vm189_vm5 = vcmp.eq.s32.totalorder %v43_v23, %v1518_v4 }
  0x56   :  { %v158_v31 = vsel %vm130_vm2, 1.0, %v100_v29  ;;  %v159_v32 = vsel %vm131_vm3, 1.0, %v101_v30  ;;  %vm246_vm6 = vcmp.eq.s32.totalorder %v42_v22, %v1525_v7  ;;  %vm247_vm7 = vcmp.eq.s32.totalorder %v43_v23, %v1525_v7  ;;  %v1908_v30 = vld [vmem:[%s2367_s2 + $0x4] sm:$0xf] }
  0x57   :  { %v216_v33 = vsel %vm188_vm4, 1.0, %v158_v31  ;;  %v217_v34 = vsel %vm189_vm5, 1.0, %v159_v32  ;;  %vm304_vm8 = vcmp.eq.s32.totalorder %v42_v22, %v1530_v8  ;;  %vm305_vm9 = vcmp.eq.s32.totalorder %v43_v23, %v1530_v8  ;;  %v1913_v31 = vld [vmem:[%s2367_s2 + $0x8] sm:$0xf0] }
  0x58   :  { %v274_v35 = vsel %vm246_vm6, 1.0, %v216_v33  ;;  %v275_v36 = vsel %vm247_vm7, 1.0, %v217_v34  ;;  %vm362_vm10 = vcmp.eq.s32.totalorder %v42_v22, %v1539_v9  ;;  %vm363_vm11 = vcmp.eq.s32.totalorder %v43_v23, %v1539_v9 }
  0x59   :  { %v332_v26 = vsel %vm304_vm8, 1.0, %v274_v35  ;;  %v333_v37 = vsel %vm305_vm9, 1.0, %v275_v36  ;;  %vm420_vm12 = vcmp.eq.s32.totalorder %v42_v22, %v1548_v13  ;;  %vm421_vm13 = vcmp.eq.s32.totalorder %v43_v23, %v1548_v13 }
  0x5a   :  { %v390_v38 = vsel %vm362_vm10, 1.0, %v332_v26  ;;  %v391_v39 = vsel %vm363_vm11, 1.0, %v333_v37  ;;  %vm478_vm14 = vcmp.eq.s32.totalorder %v42_v22, %v1555_v16  ;;  %vm479_vm15 = vcmp.eq.s32.totalorder %v43_v23, %v1555_v16 }
  0x5b   :  { %v448_v40 = vsel %vm420_vm12, 1.0, %v390_v38  ;;  %v449_v41 = vsel %vm421_vm13, 1.0, %v391_v39  ;;  %vm536_vm0 = vcmp.eq.s32.totalorder %v42_v22, %v1562_v19  ;;  %vm537_vm1 = vcmp.eq.s32.totalorder %v43_v23, %v1562_v19 }
  0x5c   :  { %v506_v42 = vsel %vm478_vm14, 1.0, %v448_v40  ;;  %v507_v43 = vsel %vm479_vm15, 1.0, %v449_v41  ;;  %vm84_vm2 = vcmp.eq.s32.totalorder %v1809_v25, %v1506_v1  ;;  %vm85_vm3 = vcmp.eq.s32.totalorder %v1812_v27, %v1506_v1  ;;  %v636_v41 = vld [vmem:[%s2368_s1] sm:$0xff] }
  0x5d   :  { %v564_v44 = vsel %vm536_vm0, 1.0, %v506_v42  ;;  %v565_v45 = vsel %vm537_vm1, 1.0, %v507_v43  ;;  %v112_v46 = vsel %vm84_vm2, 1.0, %v1451_v10  ;;  %v113_v47 = vsel %vm85_vm3, 1.0, %v1451_v10  ;;  %707 = vmatpush.msra.mxu0 %v636_v41 }
  0x5e   :  { %v589_v49 = vpack.c.bf16 %v565_v45, %v564_v44  ;;  %vm142_vm4 = vcmp.eq.s32.totalorder %v1809_v25, %v1513_v3  ;;  %vm143_vm5 = vcmp.eq.s32.totalorder %v1812_v27, %v1513_v3  ;;  %vm200_vm6 = vcmp.eq.s32.totalorder %v1809_v25, %v1518_v4 }
  0x5f   :  { %v170_v50 = vsel %vm142_vm4, 1.0, %v112_v46  ;;  %v171_v51 = vsel %vm143_vm5, 1.0, %v113_v47  ;;  %vm201_vm7 = vcmp.eq.s32.totalorder %v1812_v27, %v1518_v4  ;;  %vm258_vm8 = vcmp.eq.s32.totalorder %v1809_v25, %v1525_v7  ;;  %v987_v47 = vld [vmem:[%s2366_s4 + $0x50] sm:$0xff] }
  0x60   :  { %875 = vmatpush.bf16.msra.mxu1 %v589_v49  ;;  %v228_v52 = vsel %vm200_vm6, 1.0, %v170_v50  ;;  %v229_v53 = vsel %vm201_vm7, 1.0, %v171_v51  ;;  %vm259_vm9 = vcmp.eq.s32.totalorder %v1812_v27, %v1525_v7  ;;  %vm316_vm10 = vcmp.eq.s32.totalorder %v1809_v25, %v1530_v8  ;;  %1045 = vperm.xlu2 %1428, %v987_v47  }
  0x61   :  { %v286_v54 = vsel %vm258_vm8, 1.0, %v228_v52  ;;  %v287_v55 = vsel %vm259_vm9, 1.0, %v229_v53  ;;  %vm317_vm11 = vcmp.eq.s32.totalorder %v1812_v27, %v1530_v8  ;;  %vm374_vm12 = vcmp.eq.s32.totalorder %v1809_v25, %v1539_v9 }
  0x62   :  { %v344_v56 = vsel %vm316_vm10, 1.0, %v286_v54  ;;  %v345_v57 = vsel %vm317_vm11, 1.0, %v287_v55  ;;  %vm375_vm13 = vcmp.eq.s32.totalorder %v1812_v27, %v1539_v9  ;;  %vm432_vm14 = vcmp.eq.s32.totalorder %v1809_v25, %v1548_v13 }
  0x63   :  { %v402_v58 = vsel %vm374_vm12, 1.0, %v344_v56  ;;  %v403_v59 = vsel %vm375_vm13, 1.0, %v345_v57  ;;  %vm433_vm15 = vcmp.eq.s32.totalorder %v1812_v27, %v1548_v13  ;;  %vm490_vm0 = vcmp.eq.s32.totalorder %v1809_v25, %v1555_v16  ;;  %v1964_v57 = vld [vmem:[%s2365_s0] ss:$0 sm:$0xff] }
  0x64   :  { %v460_v60 = vsel %vm432_vm14, 1.0, %v402_v58  ;;  %v461_v61 = vsel %vm433_vm15, 1.0, %v403_v59  ;;  %vm491_vm1 = vcmp.eq.s32.totalorder %v1812_v27, %v1555_v16  ;;  %vm548_vm2 = vcmp.eq.s32.totalorder %v1809_v25, %v1562_v19 }
  0x65   :  { %v518_v62 = vsel %vm490_vm0, 1.0, %v460_v60  ;;  %v519_v63 = vsel %vm491_vm1, 1.0, %v461_v61  ;;  %vm549_vm3 = vcmp.eq.s32.totalorder %v1812_v27, %v1562_v19  ;;  %v41_v0 = vadd.s32 40, %v1508_v2  ;;  %v988_v60 = vld [vmem:[%s2366_s4 + $0x58] sm:$0xff] }
  0x66   :  { %v576_v5 = vsel %vm548_vm2, 1.0, %v518_v62  ;;  %v577_v6 = vsel %vm549_vm3, 1.0, %v519_v63  ;;  %vm70_vm4 = vcmp.eq.s32.totalorder %v1815_v28, %v1506_v1  ;;  %vm128_vm5 = vcmp.eq.s32.totalorder %v1815_v28, %v1513_v3  ;;  %v1988_v63 = vld [vmem:[%s2365_s0 + $0x2] ss:$0 sm:$0xff] }
  0x67   :  { %v595_v11 = vpack.c.bf16 %v577_v6, %v576_v5  ;;  %vm71_vm6 = vcmp.eq.s32.totalorder %v41_v0, %v1506_v1  ;;  %v98_v12 = vsel %vm70_vm4, 1.0, %v1451_v10  ;;  %vm129_vm7 = vcmp.eq.s32.totalorder %v41_v0, %v1513_v3  ;;  %v1996_v6 = vld [vmem:[%s2365_s0 + $0x3] ss:$0 sm:$0xff] }
  0x68   :  { %v99_v14 = vsel %vm71_vm6, 1.0, %v1451_v10  ;;  %v156_v15 = vsel %vm128_vm5, 1.0, %v98_v12  ;;  %vm186_vm8 = vcmp.eq.s32.totalorder %v1815_v28, %v1518_v4  ;;  %vm187_vm9 = vcmp.eq.s32.totalorder %v41_v0, %v1518_v4  ;;  %1050 = vperm.xlu2 %1428, %v988_v60   ;;  %v620_v60 = vld [vmem:[%s2369_s3 + $0x10] sm:$0xff] }
  0x69   :  { %930 = vmatpush.bf16.msra.mxu2 %v595_v11  ;;  %v157_v17 = vsel %vm129_vm7, 1.0, %v99_v14  ;;  %v214_v18 = vsel %vm186_vm8, 1.0, %v156_v15  ;;  %vm244_vm10 = vcmp.eq.s32.totalorder %v1815_v28, %v1525_v7  ;;  %vm245_vm11 = vcmp.eq.s32.totalorder %v41_v0, %v1525_v7  ;;  %v2004_v14 = vld [vmem:[%s2365_s0 + $0x4] ss:$0 sm:$0xff] }
  0x6a   :  { %v215_v20 = vsel %vm187_vm9, 1.0, %v157_v17  ;;  %v272_v21 = vsel %vm244_vm10, 1.0, %v214_v18  ;;  %vm302_vm12 = vcmp.eq.s32.totalorder %v1815_v28, %v1530_v8  ;;  %vm303_vm13 = vcmp.eq.s32.totalorder %v41_v0, %v1530_v8  ;;  %v2012_v18 = vld [vmem:[%s2365_s0 + $0x5] ss:$0 sm:$0xff] }
  0x6b   :  { %v273_v22 = vsel %vm245_vm11, 1.0, %v215_v20  ;;  %v330_v23 = vsel %vm302_vm12, 1.0, %v272_v21  ;;  %vm360_vm14 = vcmp.eq.s32.totalorder %v1815_v28, %v1539_v9  ;;  %vm361_vm15 = vcmp.eq.s32.totalorder %v41_v0, %v1539_v9  ;;  %v979_v20 = vld [vmem:[%s2366_s4 + $0x10] sm:$0xff] }
  0x6c   :  { %v331_v24 = vsel %vm303_vm13, 1.0, %v273_v22  ;;  %v388_v25 = vsel %vm360_vm14, 1.0, %v330_v23  ;;  %vm418_vm0 = vcmp.eq.s32.totalorder %v1815_v28, %v1548_v13  ;;  %vm419_vm1 = vcmp.eq.s32.totalorder %v41_v0, %v1548_v13  ;;  %v2027_v23 = vld [vmem:[%s2365_s0 + $0x6] ss:$0 sm:$0xff] }
  0x6d   :  { %v389_v27 = vsel %vm361_vm15, 1.0, %v331_v24  ;;  %v446_v29 = vsel %vm418_vm0, 1.0, %v388_v25  ;;  %vm476_vm2 = vcmp.eq.s32.totalorder %v1815_v28, %v1555_v16  ;;  %vm477_vm3 = vcmp.eq.s32.totalorder %v41_v0, %v1555_v16 }
  0x6e   :  { %v447_v32 = vsel %vm419_vm1, 1.0, %v389_v27  ;;  %v504_v33 = vsel %vm476_vm2, 1.0, %v446_v29  ;;  %vm534_vm4 = vcmp.eq.s32.totalorder %v1815_v28, %v1562_v19  ;;  %vm535_vm5 = vcmp.eq.s32.totalorder %v41_v0, %v1562_v19  ;;  %v985_v28 = vld [vmem:[%s2366_s4 + $0x40] sm:$0xff] }
  0x6f   :  { %v505_v34 = vsel %vm477_vm3, 1.0, %v447_v32  ;;  %v562_v35 = vsel %vm534_vm4, 1.0, %v504_v33  ;;  %v52_v36 = vadd.s32 128, %v1508_v2  ;;  %v53_v26 = vadd.s32 136, %v1508_v2  ;;  %1035 = vperm.xlu0 %1426, %v985_v28   ;;  %v2035_v27 = vld [vmem:[%s2365_s0 + $0x7] ss:$0 sm:$0xff] }
  0x70   :  { %v563_v37 = vsel %vm535_vm5, 1.0, %v505_v34  ;;  %v1310_v38 = vor.u32 %v1908_v30, %v1913_v31  ;;  %v1923_v39 = vadd.s32 16, %v1508_v2  ;;  %vm843_vm1 = vcmask 785408   ;;  %v2043_v31 = vld [vmem:[%s2365_s0 + $0x8] ss:$0 sm:$0xff] }
  0x71   :  { %v588_v40 = vpack.c.bf16 %v563_v37, %v562_v35  ;;  %vm82_vm6 = vcmp.eq.s32.totalorder %v52_v36, %v1506_v1  ;;  %vm83_vm7 = vcmp.eq.s32.totalorder %v53_v26, %v1506_v1  ;;  %vm140_vm8 = vcmp.eq.s32.totalorder %v52_v36, %v1513_v3  ;;  %v983_v37 = vld [vmem:[%s2366_s4 + $0x30] sm:$0xff] }
  0x72   :  { %v110_v42 = vsel %vm82_vm6, 1.0, %v1451_v10  ;;  %v111_v43 = vsel %vm83_vm7, 1.0, %v1451_v10  ;;  %vm141_vm9 = vcmp.eq.s32.totalorder %v53_v26, %v1513_v3  ;;  %vm198_vm10 = vcmp.eq.s32.totalorder %v52_v36, %v1518_v4  ;;  %v989_v3 = vld [vmem:[%s2366_s4 + $0x60] sm:$0xff]  ;;  %1025 = vperm.xlu2 %1428, %v983_v37   ;;  %v627_v37 = vld [vmem:[%s2369_s3 + $0x48] sm:$0xff] }
  0x73   :  { %876 = vmatpush.bf16.msra.mxu1 %v588_v40  ;;  %v168_v1 = vsel %vm140_vm8, 1.0, %v110_v42  ;;  %v169_v44 = vsel %vm141_vm9, 1.0, %v111_v43  ;;  %vm199_vm11 = vcmp.eq.s32.totalorder %v53_v26, %v1518_v4  ;;  %vm256_vm12 = vcmp.eq.s32.totalorder %v52_v36, %v1525_v7  ;;  %1055 = vperm.xlu1 %1427, %v989_v3   ;;  %v978_v43 = vld [vmem:[%s2366_s4 + $0x8] sm:$0xff] }
  0x74   :  { %v226_v45 = vsel %vm198_vm10, 1.0, %v168_v1  ;;  %v227_v46 = vsel %vm199_vm11, 1.0, %v169_v44  ;;  %vm257_vm13 = vcmp.eq.s32.totalorder %v53_v26, %v1525_v7  ;;  %vm314_vm14 = vcmp.eq.s32.totalorder %v52_v36, %v1530_v8 }
  0x75   :  { %v284_v48 = vsel %vm256_vm12, 1.0, %v226_v45  ;;  %v285_v49 = vsel %vm257_vm13, 1.0, %v227_v46  ;;  %vm315_vm15 = vcmp.eq.s32.totalorder %v53_v26, %v1530_v8  ;;  %vm372_vm0 = vcmp.eq.s32.totalorder %v52_v36, %v1539_v9  ;;  %v984_v8 = vld [vmem:[%s2366_s4 + $0x38] sm:$0xff]  ;;  %v1404_v46 = vld [vmem:[%s2367_s2 + $0x14] sm:$0xf] }
  0x76   :  { %v342_v4 = vsel %vm314_vm14, 1.0, %v284_v48  ;;  %v343_v7 = vsel %vm315_vm15, 1.0, %v285_v49  ;;  %vm373_vm2 = vcmp.eq.s32.totalorder %v53_v26, %v1539_v9  ;;  %vm430_vm3 = vcmp.eq.s32.totalorder %v52_v36, %v1548_v13  ;;  %v618_v48 = vld [vmem:[%s2369_s3] sm:$0xff]  ;;  %v1315_v49 = vld [vmem:[%s2367_s2 + $0x18] sm:$0xf0] }
  0x77   :  { %v400_v50 = vsel %vm372_vm0, 1.0, %v342_v4  ;;  %v401_v51 = vsel %vm373_vm2, 1.0, %v343_v7  ;;  %vm431_vm4 = vcmp.eq.s32.totalorder %v53_v26, %v1548_v13  ;;  %vm488_vm5 = vcmp.eq.s32.totalorder %v52_v36, %v1555_v16  ;;  %1030 = vperm.xlu0 %1426, %v984_v8   ;;  %v981_v4 = vld [vmem:[%s2366_s4 + $0x20] sm:$0xff] }
  0x78   :  { %v458_v52 = vsel %vm430_vm3, 1.0, %v400_v50  ;;  %v459_v53 = vsel %vm431_vm4, 1.0, %v401_v51  ;;  %vm489_vm6 = vcmp.eq.s32.totalorder %v53_v26, %v1555_v16  ;;  %vm546_vm7 = vcmp.eq.s32.totalorder %v52_v36, %v1562_v19  ;;  %v1971_v16 = vld [vmem:[%s2365_s0 + $0x1] ss:$0 sm:$0xff]  ;;  %v982_v51 = vld [vmem:[%s2366_s4 + $0x28] sm:$0xff] }
  0x79   :  { %v516_v54 = vsel %vm488_vm5, 1.0, %v458_v52  ;;  %v517_v9 = vsel %vm489_vm6, 1.0, %v459_v53  ;;  %vm547_vm8 = vcmp.eq.s32.totalorder %v53_v26, %v1562_v19  ;;  %v39_v55 = vadd.s32 24, %v1508_v2  ;;  %v990_v19 = vld [vmem:[%s2366_s4 + $0x68] sm:$0xff] }
  0x7a   :  { %v574_v56 = vsel %vm546_vm7, 1.0, %v516_v54  ;;  %v575_v13 = vsel %vm547_vm8, 1.0, %v517_v9  ;;  %vm68_vm9 = vcmp.eq.s32.totalorder %v1923_v39, %v1964_v57  ;;  %vm126_vm10 = vcmp.eq.s32.totalorder %v1923_v39, %v1971_v16  ;;  %v986_v26 = vld [vmem:[%s2366_s4 + $0x48] sm:$0xff]  ;;  %v1305_v54 = vld [vmem:[%s2367_s2] sm:$0xf]  ;;  %1020 = vperm.xlu2 %1428, %v982_v51  }
  0x7b   :  { %v594_v58 = vpack.c.bf16 %v575_v13, %v574_v56  ;;  %vm69_vm11 = vcmp.eq.s32.totalorder %v39_v55, %v1964_v57  ;;  %v96_v59 = vsel %vm68_vm9, 1.0, %v1451_v10  ;;  %vm127_vm12 = vcmp.eq.s32.totalorder %v39_v55, %v1971_v16  ;;  %1060 = vperm.xlu1 %1427, %v990_v19   ;;  %v977_v19 = vld [vmem:[%s2366_s4] sm:$0xff]  ;;  %v1415_v51 = vld [vmem:[%s2367_s2 + $0x64] sm:$0xf0] }
  0x7c   :  { %v97_v61 = vsel %vm69_vm11, 1.0, %v1451_v10  ;;  %v154_v62 = vsel %vm126_vm10, 1.0, %v96_v59  ;;  %vm184_vm13 = vcmp.eq.s32.totalorder %v1923_v39, %v1988_v63  ;;  %vm185_vm14 = vcmp.eq.s32.totalorder %v39_v55, %v1988_v63  ;;  %v1323_v59 = vld [vmem:[%s2367_s2 + $0x28] sm:$0xf0] }
  0x7d   :  { %931 = vmatpush.bf16.msra.mxu2 %v594_v58  ;;  %v155_v0 = vsel %vm127_vm12, 1.0, %v97_v61  ;;  %v212_v5 = vsel %vm184_vm13, 1.0, %v154_v62  ;;  %vm242_vm15 = vcmp.eq.s32.totalorder %v1923_v39, %v1996_v6  ;;  %vm243_vm0 = vcmp.eq.s32.totalorder %v39_v55, %v1996_v6  ;;  %v1406_v58 = vld [vmem:[%s2367_s2 + $0x24] sm:$0xf]  ;;  %v1313_v62 = vld [vmem:[%s2367_s2 + $0x10] sm:$0xf] }
  0x7e   :  { %v213_v11 = vsel %vm185_vm14, 1.0, %v155_v0  ;;  %v270_v12 = vsel %vm242_vm15, 1.0, %v212_v5  ;;  %vm300_vm2 = vcmp.eq.s32.totalorder %v1923_v39, %v2004_v14  ;;  %vm301_vm3 = vcmp.eq.s32.totalorder %v39_v55, %v2004_v14  ;;  %v621_v5 = vld [vmem:[%s2369_s3 + $0x18] sm:$0xff] }
  0x7f   :  { %v271_v15 = vsel %vm243_vm0, 1.0, %v213_v11  ;;  %v328_v17 = vsel %vm300_vm2, 1.0, %v270_v12  ;;  %vm358_vm4 = vcmp.eq.s32.totalorder %v1923_v39, %v2012_v18  ;;  %vm359_vm5 = vcmp.eq.s32.totalorder %v39_v55, %v2012_v18  ;;  %1005 = vperm.xlu0 %1426, %v979_v20   ;;  %v1331_v11 = vld [vmem:[%s2367_s2 + $0x38] sm:$0xf0]  ;;  %v622_v12 = vld [vmem:[%s2369_s3 + $0x20] sm:$0xff]  ;;  %v623_v20 = vld [vmem:[%s2369_s3 + $0x28] sm:$0xff] }
  0x80   :  { %1375 = vmatmul.msk.bf16.vlgmr.msra.gmra.mxu2 %vm843_vm1, %v1310_v38  ;;  %v329_v21 = vsel %vm301_vm3, 1.0, %v271_v15  ;;  %v386_v22 = vsel %vm358_vm4, 1.0, %v328_v17  ;;  %vm416_vm6 = vcmp.eq.s32.totalorder %v1923_v39, %v2027_v23  ;;  %vm417_vm7 = vcmp.eq.s32.totalorder %v39_v55, %v2027_v23  ;;  %v1321_v15 = vld [vmem:[%s2367_s2 + $0x20] sm:$0xf]  ;;  %v1407_v17 = vld [vmem:[%s2367_s2 + $0x24] sm:$0xf0] }
  0x81   :  { %v387_v24 = vsel %vm359_vm5, 1.0, %v329_v21  ;;  %v444_v25 = vsel %vm416_vm6, 1.0, %v386_v22  ;;  %vm474_vm8 = vcmp.eq.s32.totalorder %v1923_v39, %v2035_v27  ;;  %vm475_vm9 = vcmp.eq.s32.totalorder %v39_v55, %v2035_v27  ;;  %v1410_v21 = vld [vmem:[%s2367_s2 + $0x44] sm:$0xf]  ;;  %v1339_v22 = vld [vmem:[%s2367_s2 + $0x48] sm:$0xf0] }
  0x82   :  { %v445_v29 = vsel %vm417_vm7, 1.0, %v387_v24  ;;  %v502_v30 = vsel %vm474_vm8, 1.0, %v444_v25  ;;  %vm532_vm10 = vcmp.eq.s32.totalorder %v1923_v39, %v2043_v31  ;;  %vm533_vm11 = vcmp.eq.s32.totalorder %v39_v55, %v2043_v31  ;;  %995 = vperm.xlu2 %1428, %v977_v19   ;;  %v1329_v25 = vld [vmem:[%s2367_s2 + $0x30] sm:$0xf]  ;;  %v1128_v19 = vld [vmem:[%s2370_s6 + $0x38] sm:$0xff] }
  0x83   :  { %v503_v32 = vsel %vm475_vm9, 1.0, %v445_v29  ;;  %v560_v33 = vsel %vm532_vm10, 1.0, %v502_v30  ;;  %v37_v34 = vadd.s32 8, %v1508_v2  ;;  %vm66_vm12 = vcmp.eq.s32.totalorder %v1508_v2, %v1964_v57  ;;  %1040 = vperm.xlu1 %1427, %v986_v26   ;;  %v625_v30 = vld [vmem:[%s2369_s3 + $0x38] sm:$0xff] }
  0x84   :  { %v561_v35 = vsel %vm533_vm11, 1.0, %v503_v32  ;;  %v94_v36 = vsel %vm66_vm12, 1.0, %v1451_v10  ;;  %vm124_vm13 = vcmp.eq.s32.totalorder %v1508_v2, %v1971_v16  ;;  %vm182_vm14 = vcmp.eq.s32.totalorder %v1508_v2, %v1988_v63  ;;  %v1347_v32 = vld [vmem:[%s2367_s2 + $0x58] sm:$0xf0] }
  0x85   :  { %v587_v38 = vpack.c.bf16 %v561_v35, %v560_v33  ;;  %vm67_vm15 = vcmp.eq.s32.totalorder %v37_v34, %v1964_v57  ;;  %vm125_vm0 = vcmp.eq.s32.totalorder %v37_v34, %v1971_v16  ;;  %v152_v39 = vsel %vm124_vm13, 1.0, %v94_v36  ;;  %v619_v57 = vld [vmem:[%s2369_s3 + $0x8] sm:$0xff]  ;;  %v980_v16 = vld [vmem:[%s2366_s4 + $0x18] sm:$0xff]  ;;  %v626_v33 = vld [vmem:[%s2369_s3 + $0x40] sm:$0xff] }
  0x86   :  { %v95_v40 = vsel %vm67_vm15, 1.0, %v1451_v10  ;;  %vm183_vm2 = vcmp.eq.s32.totalorder %v37_v34, %v1988_v63  ;;  %v210_v28 = vsel %vm182_vm14, 1.0, %v152_v39  ;;  %vm240_vm3 = vcmp.eq.s32.totalorder %v1508_v2, %v1996_v6  ;;  %v1405_v63 = vld [vmem:[%s2367_s2 + $0x14] sm:$0xf0]  ;;  %v1337_v35 = vld [vmem:[%s2367_s2 + $0x40] sm:$0xf] }
  0x87   :  { %877 = vmatpush.bf16.msra.mxu1 %v587_v38  ;;  %v153_v41 = vsel %vm125_vm0, 1.0, %v95_v40  ;;  %vm241_vm4 = vcmp.eq.s32.totalorder %v37_v34, %v1996_v6  ;;  %v268_v42 = vsel %vm240_vm3, 1.0, %v210_v28  ;;  %vm298_vm5 = vcmp.eq.s32.totalorder %v1508_v2, %v2004_v14  ;;  %1000 = vperm.xlu0 %1426, %v978_v43   ;;  %v1408_v6 = vld [vmem:[%s2367_s2 + $0x34] sm:$0xf]  ;;  %v1411_v36 = vld [vmem:[%s2367_s2 + $0x44] sm:$0xf0] }
  0x88   :  { %v211_v10 = vsel %vm183_vm2, 1.0, %v153_v41  ;;  %vm299_vm6 = vcmp.eq.s32.totalorder %v37_v34, %v2004_v14  ;;  %v326_v1 = vsel %vm298_vm5, 1.0, %v268_v42  ;;  %vm356_vm7 = vcmp.eq.s32.totalorder %v1508_v2, %v2012_v18  ;;  %v1125_v38 = vld [vmem:[%s2370_s6 + $0x20] sm:$0xff]  ;;  %v1127_v39 = vld [vmem:[%s2370_s6 + $0x30] sm:$0xff]  ;;  %v1355_v28 = vld [vmem:[%s2367_s2 + $0x68] sm:$0xf0] }
  0x89   :  { %v269_v44 = vsel %vm241_vm4, 1.0, %v211_v10  ;;  %vm357_vm8 = vcmp.eq.s32.totalorder %v37_v34, %v2012_v18  ;;  %v384_v45 = vsel %vm356_vm7, 1.0, %v326_v1  ;;  %vm414_vm9 = vcmp.eq.s32.totalorder %v1508_v2, %v2027_v23  ;;  %v1414_v40 = vld [vmem:[%s2367_s2 + $0x64] sm:$0xf]  ;;  %v628_v41 = vld [vmem:[%s2369_s3 + $0x50] sm:$0xff] }
  0x8a   :  { %v327_v3 = vsel %vm299_vm6, 1.0, %v269_v44  ;;  %vm415_vm10 = vcmp.eq.s32.totalorder %v37_v34, %v2027_v23  ;;  %v442_v47 = vsel %vm414_vm9, 1.0, %v384_v45  ;;  %vm472_vm11 = vcmp.eq.s32.totalorder %v1508_v2, %v2035_v27  ;;  %v624_v23 = vld [vmem:[%s2369_s3 + $0x30] sm:$0xff]  ;;  %v1413_v10 = vld [vmem:[%s2367_s2 + $0x54] sm:$0xf0]  ;;  %1166 = vperm.xlu2 %1428, %v1128_v19  }
  0x8b   :  { %v385_v7 = vsel %vm357_vm8, 1.0, %v327_v3  ;;  %vm473_vm12 = vcmp.eq.s32.totalorder %v37_v34, %v2035_v27  ;;  %v500_v50 = vsel %vm472_vm11, 1.0, %v442_v47  ;;  %vm530_vm13 = vcmp.eq.s32.totalorder %v1508_v2, %v2043_v31  ;;  %v1403_v2 = vld [vmem:[%s2367_s2 + $0x4] sm:$0xf0]  ;;  %1015 = vperm.xlu1 %1427, %v981_v4   ;;  %v1409_v27 = vld [vmem:[%s2367_s2 + $0x34] sm:$0xf0] }
  0x8c   :  { %v443_v8 = vsel %vm415_vm10, 1.0, %v385_v7  ;;  %vm531_vm14 = vcmp.eq.s32.totalorder %v37_v34, %v2043_v31  ;;  %v558_v52 = vsel %vm530_vm13, 1.0, %v500_v50  ;;  %vm637_vm15 = vcmask 64512   ;;  %v1412_v31 = vld [vmem:[%s2367_s2 + $0x54] sm:$0xf]  ;;  %v629_v44 = vld [vmem:[%s2369_s3 + $0x58] sm:$0xff] }
  0x8d   :  { %v501_v53 = vsel %vm473_vm12, 1.0, %v443_v8  ;;  %1285 = vmatmul.msk.f32.vlgmr.msra.gmra.mxu0 %vm637_vm15, %v618_v48  ;;  %v1318_v9 = vor.u32 %v1404_v46, %v1315_v49  ;;  %v1306_v13 = vor.u32 %v1403_v2, %v1305_v54  ;;  %v1326_v61 = vor.u32 %v1406_v58, %v1323_v59  ;;  %v1345_v43 = vld [vmem:[%s2367_s2 + $0x50] sm:$0xf]  ;;  %v1124_v45 = vld [vmem:[%s2370_s6 + $0x18] sm:$0xff]  ;;  %v1126_v46 = vld [vmem:[%s2370_s6 + $0x28] sm:$0xff] }
  0x8e   :  { %v559_v55 = vsel %vm531_vm14, 1.0, %v501_v53  ;;  %v1314_v0 = vor.u32 %v1405_v63, %v1313_v62  ;;  %v1334_v14 = vor.u32 %v1408_v6, %v1331_v11  ;;  %v1322_v18 = vor.u32 %v1407_v17, %v1321_v15  ;;  %v1416_v48 = vld [vmem:[%s2367_s2 + $0x74] sm:$0xf]  ;;  %v1363_v49 = vld [vmem:[%s2367_s2 + $0x78] sm:$0xf0]  ;;  %v630_v4 = vld [vmem:[%s2369_s3 + $0x60] sm:$0xff] }
  0x8f   :  { %v586_v56 = vpack.c.bf16 %v559_v55, %v558_v52  ;;  %v1342_v24 = vor.u32 %v1410_v21, %v1339_v22  ;;  %v1330_v29 = vor.u32 %v1409_v27, %v1329_v25  ;;  %v1350_v34 = vor.u32 %v1412_v31, %v1347_v32  ;;  %1151 = vperm.xlu0 %1426, %v1125_v38   ;;  %v1353_v50 = vld [vmem:[%s2367_s2 + $0x60] sm:$0xf]  ;;  %v631_v54 = vld [vmem:[%s2369_s3 + $0x68] sm:$0xff]  ;;  %v632_v55 = vld [vmem:[%s2369_s3 + $0x70] sm:$0xff] }
  0x90   :  { %1376 = vmatmul.msk.bf16.gmra.mxu2 %vm843_vm1, %v1318_v9  ;;  %v1338_v26 = vor.u32 %v1411_v36, %v1337_v35  ;;  %v1358_v42 = vor.u32 %v1414_v40, %v1355_v28  ;;  %v1346_v1 = vor.u32 %v1413_v10, %v1345_v43  ;;  %v14_v3 = vstv %s2371_s8  ;;  %v1121_v2 = vld [vmem:[%s2370_s6] sm:$0xff]  ;;  %v633_v59 = vld [vmem:[%s2369_s3 + $0x78] sm:$0xff]  ;;  %v1123_v62 = vld [vmem:[%s2370_s6 + $0x10] sm:$0xff] }
  0x91   :  { %878 = vmatpush.bf16.msra.mxu1 %v586_v56  ;;  %15 = vst [vmem:[#allocation2] sm:$0x1] %v14_v3  ;;  %v1366_v7 = vor.u32 %v1416_v48, %v1363_v49  ;;  %v1354_v52 = vor.u32 %v1415_v51, %v1353_v50 }
  0x92   :  { %1141 = vperm.xlu2 %1428, %v1123_v62  }
  0x93   :  { %1010 = vperm.xlu1 %1427, %v980_v16  }
  0x94   :  { %879 = vmatmul.bf16.vlgmr.msra.gmra.mxu1 %v1306_v13  ;;  %v1361_v13 = vld [vmem:[%s2367_s2 + $0x70] sm:$0xf] }
  0x95   :  { %1286 = vmatmul.msk.f32.gmra.mxu0 %vm637_vm15, %v619_v57  ;;  %v1417_v57 = vld [vmem:[%s2367_s2 + $0x74] sm:$0xf0] }
  0x96   :  { %v1362_v58 = vor.u32 %v1417_v57, %v1361_v13 }
  0x97   :  { %1146 = vperm.xlu0 %1426, %v1124_v45  }
  0x98   :  { %v1253_v8 = vld [vmem:[#allocation2] sm:$0x1] }
  0x9b   :  { %1161 = vperm.xlu1 %1427, %v1127_v39  }
  0x9d   :  { %1287 = vmatmul.msk.f32.gmra.mxu0 %vm637_vm15, %v620_v60 }
  0x9f   :  { %1256 = vperm.xlu0 %1426, %v1253_v8  }
  0xa0   :  { %1377 = vmatmul.msk.bf16.gmra.mxu2 %vm843_vm1, %v1326_v61 }
  0xa3   :  { %1156 = vperm.xlu1 %1427, %v1126_v46  }
  0xa4   :  { %884 = vmatmul.bf16.gmra.mxu1 %v1314_v0 }
  0xa5   :  { %1288 = vmatmul.msk.f32.gmra.mxu0 %vm637_vm15, %v621_v5 }
  0xab   :  { %1131 = vperm.xlu1 %1427, %v1121_v2  }
  0xad   :  { %1289 = vmatmul.msk.f32.gmra.mxu0 %vm637_vm15, %v622_v12  ;;  %v1122_v12 = vld [vmem:[%s2370_s6 + $0x8] sm:$0xff] }
  0xae   :  { %1136 = vperm.xlu2 %1428, %v1122_v12  }
  0xb0   :  { %1378 = vmatmul.msk.bf16.gmra.mxu2 %vm843_vm1, %v1334_v14 }
  0xb3   :  { %v2240_v47 = vpop.permute.xlu0 %1065 }
  0xb4   :  { %889 = vmatmul.bf16.gmra.mxu1 %v1322_v18 }
  0xb5   :  { %1290 = vmatmul.msk.f32.gmra.mxu0 %vm637_vm15, %v623_v20 }
  0xba   :  { %v2259_v53 = vpop.permute.xlu2 %1045 }
  0xbb   :  { %v2267_v9 = vpop.permute.xlu0 %1070 }
  0xbd   :  { %1291 = vmatmul.msk.f32.gmra.mxu0 %vm637_vm15, %v624_v23 }
  0xc0   :  { %1379 = vmatmul.msk.bf16.gmra.mxu2 %vm843_vm1, %v1342_v24 }
  0xc2   :  { %v2273_v56 = vpop.permute.xlu2 %1050 }
  0xc4   :  { %894 = vmatmul.bf16.gmra.mxu1 %v1330_v29 }
  0xc5   :  { %1292 = vmatmul.msk.f32.gmra.mxu0 %vm637_vm15, %v625_v30 }
  0xcc   :  { %v2295_v63 = vpop.permute.xlu2 %1025 }
  0xcd   :  { %1293 = vmatmul.msk.f32.gmra.mxu0 %vm637_vm15, %v626_v33 }
  0xd0   :  { %1380 = vmatmul.msk.bf16.gmra.mxu2 %vm843_vm1, %v1350_v34 }
  0xd4   :  { %899 = vmatmul.bf16.gmra.mxu1 %v1338_v26  ;;  %v1021_v14 = vpop.permute.xlu2 %1020 }
  0xd5   :  { %1294 = vmatmul.msk.f32.gmra.mxu0 %vm637_vm15, %v627_v37 }
  0xdc   :  { %v996_v24 = vpop.permute.xlu2 %995 }
  0xdd   :  { %1295 = vmatmul.msk.f32.gmra.mxu0 %vm637_vm15, %v628_v41 }
  0xe0   :  { %1381 = vmatmul.msk.bf16.gmra.mxu2 %vm843_vm1, %v1358_v42 }
  0xe1   :  { %v2282_v16 = vpop.permute.xlu0 %1035 }
  0xe4   :  { %904 = vmatmul.bf16.gmra.mxu1 %v1346_v1 }
  0xe5   :  { %1296 = vmatmul.msk.f32.gmra.mxu0 %vm637_vm15, %v629_v44  ;;  %v2290_v60 = vpop.permute.xlu1 %1055 }
  0xe9   :  { %v2298_v0 = vpop.permute.xlu0 %1030 }
  0xed   :  { %1297 = vmatmul.msk.f32.gmra.mxu0 %vm637_vm15, %v630_v4  ;;  %v2300_v11 = vpop.permute.xlu1 %1060 }
  0xf0   :  { %1382 = vmatmul.msk.bf16.gmra.mxu2 %vm843_vm1, %v1366_v7 }
  0xf1   :  { %v1006_v17 = vpop.permute.xlu0 %1005 }
  0xf4   :  { %909 = vmatmul.bf16.gmra.mxu1 %v1354_v52 }
  0xf5   :  { %1298 = vmatmul.msk.f32.gmra.mxu0 %vm637_vm15, %v631_v54  ;;  %v2305_v23 = vpop.permute.xlu1 %1040 }
  0xf9   :  { %v1001_v30 = vpop.permute.xlu0 %1000 }
  0xfd   :  { %1299 = vmatmul.msk.f32.gmra.mxu0 %vm637_vm15, %v632_v55  ;;  %v1016_v37 = vpop.permute.xlu1 %1015 }
 0x103   :  { %v933_v61 = vpop.f32.mrf.mxu2 }
 0x104   :  { %914 = vmatmul.bf16.gmra.mxu1 %v1362_v58 }
 0x105   :  { %1300 = vmatmul.msk.f32.gmra.mxu0 %vm637_vm15, %v633_v59  ;;  %v1011_v1 = vpop.permute.xlu1 %1010 }
 0x10a   :  { %v709_v5 = vpop.f32.mrf.mxu0 }
 0x10b   :  { %v935_v6 = vpop.f32.mrf.mxu2 }
 0x111   :  { %v880_v15 = vpop.f32.mrf.mxu1 }
 0x112   :  { %v881_v18 = vadd.f32 %v880_v15, %v709_v5  ;;  %v712_v20 = vpop.f32.mrf.mxu0 }
 0x113   :  { %v938_v21 = vpop.f32.mrf.mxu2 }
 0x114   :  { %v934_v22 = vadd.f32 %v933_v61, %v881_v18 }
 0x116   :  { %v1073_v32 = vadd.f32 %v996_v24, %v934_v22 }
 0x118   :  { %v1089_v35 = vmax.f32 %v1073_v32, 0.0 }
 0x119   :  { %v882_v25 = vpop.f32.mrf.mxu1 }
 0x11a   :  { %v883_v27 = vadd.f32 %v882_v25, %v712_v20  ;;  %v715_v29 = vpop.f32.mrf.mxu0 }
 0x11b   :  { %v940_v31 = vpop.f32.mrf.mxu2 }
 0x11c   :  { %v936_v33 = vadd.f32 %v935_v6, %v883_v27 }
 0x11e   :  { %v1074_v34 = vadd.f32 %v1001_v30, %v936_v33 }
 0x120   :  { %v1090_v36 = vmax.f32 %v1074_v34, 0.0 }
 0x121   :  { %v885_v26 = vpop.f32.mrf.mxu1 }
 0x122   :  { %v886_v38 = vadd.f32 %v885_v26, %v715_v29  ;;  %v718_v39 = vpop.f32.mrf.mxu0  ;;  %v2307_v40 = vpack.c.bf16 %v1090_v36, %v1089_v35 }
 0x123   :  { %v943_v28 = vpop.f32.mrf.mxu2 }
 0x124   :  { %v939_v41 = vadd.f32 %v938_v21, %v886_v38 }
 0x126   :  { %v1075_v46 = vadd.f32 %v1006_v17, %v939_v41 }
 0x128   :  { %v1091_v49 = vmax.f32 %v1075_v46, 0.0 }
 0x129   :  { %v887_v42 = vpop.f32.mrf.mxu1 }
 0x12a   :  { %v888_v43 = vadd.f32 %v887_v42, %v718_v39  ;;  %v721_v10 = vpop.f32.mrf.mxu0 }
 0x12b   :  { %v945_v44 = vpop.f32.mrf.mxu2 }
 0x12c   :  { %v941_v45 = vadd.f32 %v940_v31, %v888_v43 }
 0x12e   :  { %v1076_v3 = vadd.f32 %v1011_v1, %v941_v45 }
 0x130   :  { %v1092_v48 = vmax.f32 %v1076_v3, 0.0 }
 0x131   :  { %v890_v4 = vpop.f32.mrf.mxu1 }
 0x132   :  { %v891_v7 = vadd.f32 %v890_v4, %v721_v10  ;;  %v724_v50 = vpop.f32.mrf.mxu0  ;;  %v2309_v51 = vpack.c.bf16 %v1092_v48, %v1091_v49 }
 0x133   :  { %v948_v8 = vpop.f32.mrf.mxu2 }
 0x134   :  { %v944_v52 = vadd.f32 %v943_v28, %v891_v7 }
 0x136   :  { %v1077_v19 = vadd.f32 %v1016_v37, %v944_v52 }
 0x138   :  { %v1093_v59 = vmax.f32 %v1077_v19, 0.0 }
 0x139   :  { %v892_v54 = vpop.f32.mrf.mxu1 }
 0x13a   :  { %v893_v2 = vadd.f32 %v892_v54, %v724_v50  ;;  %v727_v55 = vpop.f32.mrf.mxu0 }
 0x13b   :  { %v950_v13 = vpop.f32.mrf.mxu2 }
 0x13c   :  { %v946_v57 = vadd.f32 %v945_v44, %v893_v2 }
 0x13e   :  { %v1078_v58 = vadd.f32 %v1021_v14, %v946_v57 }
 0x140   :  { %v1094_v61 = vmax.f32 %v1078_v58, 0.0 }
 0x141   :  { %v895_v62 = vpop.f32.mrf.mxu1 }
 0x142   :  { %v896_v5 = vadd.f32 %v895_v62, %v727_v55  ;;  %v730_v6 = vpop.f32.mrf.mxu0  ;;  %v2311_v12 = vpack.c.bf16 %v1094_v61, %v1093_v59 }
 0x143   :  { %v953_v17 = vpop.f32.mrf.mxu2 }
 0x144   :  { %v949_v15 = vadd.f32 %v948_v8, %v896_v5 }
 0x146   :  { %v1079_v24 = vadd.f32 %v2295_v63, %v949_v15 }
 0x148   :  { %v1095_v29 = vmax.f32 %v1079_v24, 0.0 }
 0x149   :  { %v897_v18 = vpop.f32.mrf.mxu1 }
 0x14a   :  { %v898_v20 = vadd.f32 %v897_v18, %v730_v6  ;;  %v733_v21 = vpop.f32.mrf.mxu0 }
 0x14b   :  { %v955_v27 = vpop.f32.mrf.mxu2 }
 0x14c   :  { %v951_v22 = vadd.f32 %v950_v13, %v898_v20 }
 0x14e   :  { %v1080_v25 = vadd.f32 %v2298_v0, %v951_v22 }
 0x150   :  { %v1096_v14 = vmax.f32 %v1080_v25, 0.0 }
 0x151   :  { %v900_v30 = vpop.f32.mrf.mxu1 }
 0x152   :  { %v901_v31 = vadd.f32 %v900_v30, %v733_v21  ;;  %v736_v32 = vpop.f32.mrf.mxu0  ;;  %v1108_v33 = vpack.c.bf16 %v1096_v14, %v1095_v29 }
 0x153   :  { %v958_v36 = vpop.f32.mrf.mxu2 }
 0x154   :  { %v954_v34 = vadd.f32 %v953_v17, %v901_v31 }
 0x156   :  { %v1081_v29 = vadd.f32 %v2282_v16, %v954_v34  ;;  %v1422_v16 = vld [vmem:[%s2372_s5 + $0x10] sm:$0xff]  ;;  %v1371_v34 = vld [vmem:[%s2367_s2 + $0x88] sm:$0xf0] }
 0x159   :  { %v902_v35 = vpop.f32.mrf.mxu1 }
 0x15a   :  { %v739_v26 = vpop.f32.mrf.mxu0  ;;  %v903_v19 = vadd.f32 %v902_v35, %v736_v32 }
 0x15b   :  { %v960_v39 = vpop.f32.mrf.mxu2 }
 0x15c   :  { %v956_v17 = vadd.f32 %v955_v27, %v903_v19 }
 0x161   :  { %v905_v37 = vpop.f32.mrf.mxu1 }
 0x162   :  { %v742_v38 = vpop.f32.mrf.mxu0  ;;  %v906_v2 = vadd.f32 %v905_v37, %v739_v26  ;;  %v1419_v26 = vld [vmem:[%s2367_s2 + $0x84] sm:$0xf0] }
 0x163   :  { %v963_v42 = vpop.f32.mrf.mxu2 }
 0x164   :  { %v959_v62 = vadd.f32 %v958_v36, %v906_v2  ;;  %v1369_v36 = vld [vmem:[%s2367_s2 + $0x80] sm:$0xf] }
 0x165   :  { %v1370_v37 = vor.u32 %v1419_v26, %v1369_v36 }
 0x167   :  { %919 = vmatmul.bf16.gmra.mxu1 %v1370_v37 }
 0x169   :  { %v907_v28 = vpop.f32.mrf.mxu1 }
 0x16a   :  { %v745_v41 = vpop.f32.mrf.mxu0  ;;  %v908_v50 = vadd.f32 %v907_v28, %v742_v38  ;;  %v1162_v28 = vpop.permute.xlu1 %1161 }
 0x16b   :  { %v965_v0 = vpop.f32.mrf.mxu2 }
 0x16c   :  { %v961_v58 = vadd.f32 %v960_v39, %v908_v50  ;;  %v1167_v39 = vpop.permute.xlu2 %1166 }
 0x16e   :  { %v1084_v21 = vadd.f32 %v2273_v56, %v961_v58  ;;  %v1421_v56 = vld [vmem:[%s2372_s5 + $0x8] sm:$0xff] }
 0x170   :  { %v1100_v25 = vmax.f32 %v1084_v21, 0.0 }
 0x171   :  { %v910_v63 = vpop.f32.mrf.mxu1 }
 0x172   :  { %v748_v43 = vpop.f32.mrf.mxu0  ;;  %v911_v49 = vadd.f32 %v910_v63, %v745_v41  ;;  %v634_v41 = vld [vmem:[%s2369_s3 + $0x80] sm:$0xff]  ;;  %v1152_v63 = vpop.permute.xlu0 %1151 }
 0x173   :  { %v968_v44 = vpop.f32.mrf.mxu2  ;;  %1301 = vmatmul.msk.f32.gmra.mxu0 %vm637_vm15, %v634_v41 }
 0x174   :  { %v964_v55 = vadd.f32 %v963_v42, %v911_v49 }
 0x176   :  { %v1085_v15 = vadd.f32 %v2290_v60, %v964_v55  ;;  %v1097_v60 = vmax.f32 %v1081_v29, 0.0 }
 0x178   :  { %v1101_v22 = vmax.f32 %v1085_v15, 0.0  ;;  %v1234_v15 = vld [vmem:[%s2373_s7] sm:$0xf] }
 0x179   :  { %v912_v10 = vpop.f32.mrf.mxu1 }
 0x17a   :  { %v751_v1 = vpop.f32.mrf.mxu0  ;;  %v913_v3 = vadd.f32 %v912_v10, %v748_v43  ;;  %v635_v43 = vld [vmem:[%s2369_s3 + $0x88] sm:$0xff] }
 0x17b   :  { %v970_v54 = vpop.f32.mrf.mxu2  ;;  %1302 = vmatmul.msk.f32.gmra.mxu0 %vm637_vm15, %v635_v43 }
 0x17c   :  { %v966_v8 = vadd.f32 %v965_v0, %v913_v3  ;;  %v1142_v0 = vpop.permute.xlu2 %1141 }
 0x17e   :  { %v1086_v61 = vadd.f32 %v2300_v11, %v966_v8 }
 0x180   :  { %v1102_v20 = vmax.f32 %v1086_v61, 0.0 }
 0x181   :  { %v915_v45 = vpop.f32.mrf.mxu1 }
 0x182   :  { %v916_v46 = vadd.f32 %v915_v45, %v751_v1  ;;  %v754_v48 = vpop.f32.mrf.mxu0  ;;  %v1111_v24 = vpack.c.bf16 %v1102_v20, %v1101_v22  ;;  %v1157_v1 = vpop.permute.xlu1 %1156 }
 0x184   :  { %v969_v4 = vadd.f32 %v968_v44, %v916_v46  ;;  %v1137_v2 = vpop.permute.xlu2 %1136 }
 0x186   :  { %v1087_v57 = vadd.f32 %v2240_v47, %v969_v4  ;;  %v1083_v47 = vadd.f32 %v2259_v53, %v959_v62  ;;  %v1420_v53 = vld [vmem:[%s2372_s5] sm:$0xff]  ;;  %v1147_v4 = vpop.permute.xlu0 %1146 }
 0x188   :  { %v1103_v5 = vmax.f32 %v1087_v57, 0.0  ;;  %v1099_v11 = vmax.f32 %v1083_v47, 0.0 }
 0x189   :  { %v917_v7 = vpop.f32.mrf.mxu1 }
 0x18a   :  { %v918_v52 = vadd.f32 %v917_v7, %v754_v48  ;;  %v1110_v14 = vpack.c.bf16 %v1100_v25, %v1099_v11  ;;  %v1132_v19 = vpop.permute.xlu1 %1131 }
 0x18c   :  { %v971_v13 = vadd.f32 %v970_v54, %v918_v52 }
 0x18e   :  { %v1088_v59 = vadd.f32 %v2267_v9, %v971_v13  ;;  %v1082_v9 = vadd.f32 %v2305_v23, %v956_v17  ;;  %v1423_v23 = vld [vmem:[%s2372_s5 + $0x18] sm:$0xff] }
 0x190   :  { %v1104_v6 = vmax.f32 %v1088_v59, 0.0  ;;  %v1098_v30 = vmax.f32 %v1082_v9, 0.0  ;;  %v1257_v9 = vpop.permute.xlu0 %1256 }
 0x191   :  { %v1259_v29 = vperm.slane %v1257_v9, 0 }
 0x192   :  { %v1112_v18 = vpack.c.bf16 %v1104_v6, %v1103_v5  ;;  %v1109_v27 = vpack.c.bf16 %v1098_v30, %v1097_v60 }
 0x194   :  { %1193 = vmatpush.bf16.msra.mxu3 %v1112_v18 }
 0x198   :  { %1194 = vmatpush.bf16.msra.mxu3 %v1111_v24 }
 0x19c   :  { %1195 = vmatpush.bf16.msra.mxu3 %v1110_v14 }
 0x1a0   :  { %1196 = vmatpush.bf16.msra.mxu3 %v1109_v27 }
 0x1a4   :  { %1197 = vmatpush.bf16.msra.mxu3 %v1108_v33  ;;  %v1418_v33 = vld [vmem:[%s2367_s2 + $0x84] sm:$0xf] }
 0x1a5   :  { %v1374_v35 = vor.u32 %v1418_v33, %v1371_v34 }
 0x1a7   :  { %1383 = vmatmul.msk.bf16.gmra.mxu2 %vm843_vm1, %v1374_v35  ;;  %vm1235_vm1 = vcmask 523264  }
 0x1a8   :  { %1198 = vmatpush.bf16.msra.mxu3 %v2311_v12 }
 0x1ac   :  { %1199 = vmatpush.bf16.msra.mxu3 %v2309_v51 }
 0x1b0   :  { %1200 = vmatpush.bf16.msra.mxu3 %v2307_v40 }
 0x1b3   :  { %1201 = vmatmul.bf16.vlgmr.msra.gmra.mxu3 %v1420_v53 }
 0x1c3   :  { %1206 = vmatmul.bf16.gmra.mxu3 %v1421_v56 }
 0x1d3   :  { %1211 = vmatmul.bf16.gmra.mxu3 %v1422_v16 }
 0x1e3   :  { %1216 = vmatmul.bf16.gmra.mxu3 %v1423_v23 }
 0x1e4   :  { %v920_v17 = vpop.f32.mrf.mxu1 }
 0x1ec   :  { %v922_v21 = vpop.f32.mrf.mxu1 }
 0x1f0   :  { %v757_v20 = vpop.f32.mrf.mxu0 }
 0x1f1   :  { %v921_v24 = vadd.f32 %v920_v17, %v757_v20 }
 0x1f8   :  { %v760_v47 = vpop.f32.mrf.mxu0 }
 0x22a   :  { %v973_v18 = vpop.f32.mrf.mxu2 }
 0x22b   :  { %v974_v25 = vadd.f32 %v973_v18, %v921_v24 }
 0x232   :  { %v975_v22 = vpop.f32.mrf.mxu2 }
 0x236   :  { %v1202_v51 = vpop.f32.mrf.mxu3 }
 0x237   :  { %v1203_v58 = vadd.f32 %v1202_v51, %v1132_v19 }
 0x239   :  { %v1222_v5 = vmax.f32 %v1203_v58, 0.0 }
 0x23e   :  { %v1204_v12 = vpop.f32.mrf.mxu3 }
 0x23f   :  { %v1205_v55 = vadd.f32 %v1204_v12, %v1137_v2 }
 0x241   :  { %v1223_v61 = vmax.f32 %v1205_v55, 0.0 }
 0x243   :  { %v1230_v6 = vpack.c.bf16 %v1223_v61, %v1222_v5 }
 0x246   :  { %v1207_v31 = vpop.f32.mrf.mxu3 }
 0x247   :  { %v1208_v52 = vadd.f32 %v1207_v31, %v1142_v0 }
 0x249   :  { %v1224_v59 = vmax.f32 %v1208_v52, 0.0 }
 0x24e   :  { %v1209_v40 = vpop.f32.mrf.mxu3 }
 0x24f   :  { %v1210_v7 = vadd.f32 %v1209_v40, %v1147_v4 }
 0x251   :  { %v1225_v13 = vmax.f32 %v1210_v7, 0.0 }
 0x253   :  { %v1231_v62 = vpack.c.bf16 %v1225_v13, %v1224_v59 }
 0x256   :  { %v1212_v32 = vpop.f32.mrf.mxu3 }
 0x257   :  { %v1213_v3 = vadd.f32 %v1212_v32, %v1152_v63 }
 0x259   :  { %v1226_v54 = vmax.f32 %v1213_v3, 0.0 }
 0x25e   :  { %v1214_v38 = vpop.f32.mrf.mxu3 }
 0x25f   :  { %v1215_v45 = vadd.f32 %v1214_v38, %v1157_v1 }
 0x261   :  { %v1227_v50 = vmax.f32 %v1215_v45, 0.0 }
 0x263   :  { %v1232_v57 = vpack.c.bf16 %v1227_v50, %v1226_v54 }
 0x266   :  { %v1217_v42 = vpop.f32.mrf.mxu3 }
 0x267   :  { %v1218_v10 = vadd.f32 %v1217_v42, %v1162_v28 }
 0x269   :  { %v1228_v48 = vmax.f32 %v1218_v10, 0.0 }
 0x26e   :  { %v1219_v44 = vpop.f32.mrf.mxu3 }
 0x26f   :  { %v1220_v46 = vadd.f32 %v1219_v44, %v1167_v39 }
 0x271   :  { %v1229_v49 = vmax.f32 %v1220_v46, 0.0 }
 0x273   :  { %v1233_v8 = vpack.c.bf16 %v1229_v49, %v1228_v48 }
 0x275   :  { %1243 = vmatpush.bf16.msrb.mxu3 %v1233_v8 }
 0x279   :  { %1244 = vmatpush.bf16.msrb.mxu3 %v1232_v57 }
 0x27d   :  { %1245 = vmatpush.bf16.msrb.mxu3 %v1231_v62 }
 0x281   :  { %1246 = vmatpush.bf16.msrb.mxu3 %v1230_v6 }
 0x284   :  { %1400 = vmatmul.msk.bf16.vlgmr.msrb.gmra.mxu3 %vm1235_vm1, %v1234_v15 }
 0x307   :  { %v1248_v11 = vpop.f32.mrf.mxu3 }
 0x308   :  { %v1252_v14 = vadd.f32 %v1248_v11, %v974_v25 }
 0x30a   :  { %v1260_v30 = vadd.f32 %v1259_v29, %v1252_v14 }
 0x30c   :  { %v1401_v60 = vmul.f32 -1.442695, %v1260_v30 }
 0x30e   :  { %1438 = vpow2.f32 %v1401_v60 }
 0x30f   :  { %v1250_v27 = vpop.f32.mrf.mxu3 }
 0x314   :  { %v1439_v53 = vpop.eup %1438 }
 0x315   :  { %v1264_v56 = vadd.f32 1.0, %v1439_v53 }
 0x317   :  { %1440 = vrcp.f32 %v1264_v56  ;;  %v1276_v12 = vand.u32 2147483648, %v1264_v56  ;;  %v1274_v40 = vand.u32 2147483647, %v1264_v56  ;;  %vm1270_vm2 = vweird.f32 %v1264_v56 }
 0x319   :  { %v1277_v33 = vor.u32 1.1754944e-38, %v1276_v12  ;;  %vm1275_vm4 = vcmp.eq.f32.partialorder %v1274_v40, 8.507059e+37 }
 0x31d   :  { %v1441_v16 = vpop.eup %1440 }
 0x31e   :  { %v1266_v23 = vmul.f32 %v1441_v16, %v1264_v56  ;;  %vm1271_vm0 = vweird.f32 %v1441_v16 }
 0x31f   :  { %vm1272_vm3 = vmor %vm1270_vm2, %vm1271_vm0 }
 0x320   :  { %v1267_v51 = vsub.f32 1.0, %v1266_v23 }
 0x322   :  { %v1268_v31 = vmul.f32 %v1441_v16, %v1267_v51 }
 0x324   :  { %v1269_v32 = vadd.f32 %v1441_v16, %v1268_v31 }
 0x326   :  { %v1273_v34 = vsel %vm1272_vm3, %v1441_v16, %v1269_v32 }
 0x327   :  { %v1278_v35 = vsel %vm1275_vm4, %v1277_v33, %v1273_v34 }
 0x328   :  { %1280 = vst [vmem:[%s2374_s9] sm:$0x1] %v1278_v35 }

</bundles_post_ra>
